<compile_context>
chip_gen: v6e
topology: v6e:2x2x1
jax: 0.10.0
libtpu: 0.0.40
codegen_flags: <defaults>
</compile_context>

<pallas_src>
import functools

import jax
import jax.numpy as jnp
from jax.experimental import pallas as pl
from jax.experimental.pallas import tpu as pltpu


# ----------------------------------------------------------------------------
# Fused kernel: in-VMEM im2col -> conv matmul + bias + ReLU -> H-mean pool
#               -> merged heads matmul.  One grid axis over batch tiles.
# ----------------------------------------------------------------------------
def _fused_kernel(x_ref, wconv_ref, bconv_ref, heads_w_ref, heads_b_ref, out_ref,
                  *, KH, KW, H, W, Cin):
    # x_ref       : (B_TILE, H+KH-1, (W+KW-1)*Cin)  zero-padded NHWC, (w, ci) on lanes
    # wconv_ref   : (KH*KW*W*Cin, W*Cout)           tap-block-diagonal conv weight
    # bconv_ref   : (1, W*Cout)                     conv bias tiled over W
    # heads_w_ref : (W*Cout, DOUT_PAD)              heads (all concatenated) * 1/W
    # heads_b_ref : (1, DOUT_PAD)
    # out_ref     : (B_TILE, DOUT_PAD)
    B = x_ref.shape[0]

    # In-VMEM im2col: 9 statically shifted taps of the padded input, concatenated
    # along lanes.  tap value at lane (w*Cin + ci) == x_pad[b, h+kh, w+kw, ci].
    taps = [x_ref[:, kh:kh + H, Cin * kw:Cin * (kw + W)]
            for kh in range(KH) for kw in range(KW)]
    patches = jnp.concatenate(taps, axis=-1)                 # (B, H, KH*KW*W*Cin)
    patches = patches.reshape(B * H, KH * KW * W * Cin)

    # Conv as one MXU matmul; output lanes ordered (w, cout) -> lane-dense 512.
    conv = jnp.dot(patches, wconv_ref[...],
                   preferred_element_type=jnp.float32)       # (B*H, W*Cout), f32 acc
    conv = jnp.maximum(conv + bconv_ref[...], 0.0)           # bias + ReLU (f32)

    # Global-average-pool over H as a sublane reduction (MXU stays free);
    # the 1/W pooling over W is folded into heads_w.
    feats = jnp.mean(conv.reshape(B, H, -1), axis=1)         # (B, W*Cout)

    out = jnp.dot(feats, heads_w_ref[...],
                  preferred_element_type=jnp.float32) + heads_b_ref[...]
    out_ref[...] = out.astype(out_ref.dtype)


# ----------------------------------------------------------------------------
# Forward: NCHW input -> dict of per-head logits (PyTorch semantics).
# ----------------------------------------------------------------------------
def multi_output_net_forward(x_nchw, params, *, conv_dtype=jnp.float32,
                             b_tile_max=48):
    # b_tile_max: 48 fits v5e's 16 MiB default scoped VMEM.  On v6e raise to
    # ~96-128 together with pltpu.CompilerParams(vmem_limit_bytes=...); on v7x
    # (64 MiB physical VMEM) keep <=128 and make sure the grid has >=2 steps so
    # the "parallel" batch axis shards across both TensorCores.
    conv_w = params["conv_w"]          # (Cout, Cin, KH, KW)  PyTorch OIHW layout
    conv_b = params["conv_b"]          # (Cout,)
    heads = params["heads"]            # {name: (w (dout, Cout), b (dout,))}

    Cout, Cin, KH, KW = conv_w.shape
    N, Cin_x, H, W = x_nchw.shape
    assert Cin_x == Cin
    ph, pw = (KH - 1) // 2, (KW - 1) // 2
    Hp, Wp = H + 2 * ph, W + 2 * pw
    WCout = W * Cout
    Kbig = KH * KW * W * Cin

    # ---- Input layout: NCHW -> zero-padded NHWC with (w, ci) fused on lanes. ----
    # This is the only HBM pass over the activations (no im2col materialization).
    x = jnp.transpose(x_nchw, (0, 2, 3, 1))                           # NHWC
    xp = jnp.pad(x, ((0, 0), (ph, ph), (pw, pw), (0, 0)))
    xp = xp.reshape(N, Hp, Wp * Cin).astype(conv_dtype)               # (N, Hp, Wp*Cin)

    # ---- Conv weight -> tap-block-diagonal (KH*KW*W*Cin, W*Cout) matrix. ----
    # Row index = t*(W*Cin) + w*Cin + ci  (t = kh*KW + kw);
    # Col index = w_out*Cout + co; nonzero only where w == w_out.
    w_taps = jnp.transpose(conv_w, (2, 3, 1, 0)).reshape(KH * KW, Cin, Cout)
    eye_w = jnp.eye(W, dtype=jnp.float32)
    wconv = jnp.einsum("tic,wv->twivc", w_taps.astype(jnp.float32), eye_w)
    wconv = wconv.reshape(Kbig, WCout).astype(conv_dtype)
    bconv = jnp.tile(conv_b.astype(jnp.float32), W)[None, :]          # (1, W*Cout)

    # ---- Classifier heads merged into one lane-dense (W*Cout, 128k) matrix;
    #      the 1/W of the global-average-pool is folded in. Biases likewise. ----
    names = sorted(heads.keys())
    douts = [heads[n][0].shape[0] for n in names]
    total = sum(douts)
    DOUT_PAD = max(128, ((total + 127) // 128) * 128)
    heads_cat = jnp.zeros((Cout, DOUT_PAD), jnp.float32)
    heads_b = jnp.zeros((1, DOUT_PAD), jnp.float32)
    offsets = {}
    off = 0
    for n, d in zip(names, douts):
        w_h, b_h = heads[n]
        heads_cat = heads_cat.at[:, off:off + d].set(w_h.T.astype(jnp.float32))
        heads_b = heads_b.at[:, off:off + d].set(b_h.astype(jnp.float32)[None, :])
        offsets[n] = (off, d)
        off += d
    heads_eff = jnp.tile(heads_cat, (W, 1)) / float(W)                # (W*Cout, DOUT_PAD)

    # ---- Batch tiling: one block for small N, b_tile_max-row tiles otherwise. ----
    if N <= b_tile_max:
        B_TILE, Npad = N, N
    else:
        B_TILE = (b_tile_max // 8) * 8                                # multiple of 8
        Npad = ((N + B_TILE - 1) // B_TILE) * B_TILE
        xp = jnp.pad(xp, ((0, Npad - N), (0, 0), (0, 0)))
    n_steps = Npad // B_TILE

    if n_steps >= 2:
        # Deepen pipelining only on the streamed operand (weights stay resident).
        x_spec = pl.BlockSpec((B_TILE, Hp, Wp * Cin), lambda b: (b, 0, 0),
                              pipeline_mode=pl.Buffered(3))
    else:
        x_spec = pl.BlockSpec((B_TILE, Hp, Wp * Cin), lambda b: (b, 0, 0))

    kernel = functools.partial(_fused_kernel, KH=KH, KW=KW, H=H, W=W, Cin=Cin)
    out = pl.pallas_call(
        kernel,
        out_shape=jax.ShapeDtypeStruct((Npad, DOUT_PAD), jnp.float32),
        grid=(n_steps,),
        in_specs=[
            x_spec,
            pl.BlockSpec((Kbig, WCout), lambda b: (0, 0)),
            pl.BlockSpec((1, WCout), lambda b: (0, 0)),
            pl.BlockSpec((WCout, DOUT_PAD), lambda b: (0, 0)),
            pl.BlockSpec((1, DOUT_PAD), lambda b: (0, 0)),
        ],
        out_specs=pl.BlockSpec((B_TILE, DOUT_PAD), lambda b: (b, 0)),
        compiler_params=pltpu.CompilerParams(
            dimension_semantics=("parallel",)),
    )(xp, wconv, bconv, heads_eff, heads_b)

    # Slice the padded all-heads slab into the per-head dict (PyTorch forward output).
    return {n: out[:N, o:o + d] for n, (o, d) in offsets.items()}


# ----------------------------------------------------------------------------
# Parameter init (PyTorch layouts) and a pure-JAX reference for validation.
# ----------------------------------------------------------------------------
def init_params(key, Cin=4, Cout=32, KH=3, KW=3, head_dims=None):
    if head_dims is None:
        head_dims = {"head_a": 10, "head_b": 5}
    k_w, k_b, k_h = jax.random.split(key, 3)
    conv_w = 0.1 * jax.random.normal(k_w, (Cout, Cin, KH, KW), jnp.float32)
    conv_b = 0.05 * jax.random.normal(k_b, (Cout,), jnp.float32)
    heads = {}
    hkeys = jax.random.split(k_h, len(head_dims))
    for hk, (name, dout) in zip(hkeys, sorted(head_dims.items())):
        kw_, kb_ = jax.random.split(hk)
        heads[name] = (0.1 * jax.random.normal(kw_, (dout, Cout), jnp.float32),
                       0.05 * jax.random.normal(kb_, (dout,), jnp.float32))
    return {"conv_w": conv_w, "conv_b": conv_b, "heads": heads}


def reference_forward(x_nchw, params):
    y = jax.lax.conv_general_dilated(
        x_nchw, params["conv_w"], window_strides=(1, 1), padding="SAME",
        dimension_numbers=("NCHW", "OIHW", "NCHW"),
        precision=jax.lax.Precision.HIGHEST)
    y = jax.nn.relu(y + params["conv_b"][None, :, None, None])
    feats = jnp.mean(y, axis=(2, 3))
    out = {}
    for n, (w, b) in params["heads"].items():
        out[n] = jnp.dot(feats, w.T, precision=jax.lax.Precision.HIGHEST) + b
    return out


if __name__ == "__main__":
    key = jax.random.PRNGKey(0)
    k_x, k_p = jax.random.split(key)

    N, Cin, H, W = 2, 4, 16, 16
    x = jax.random.normal(k_x, (N, Cin, H, W), jnp.float32)      # NCHW input
    params = init_params(k_p, Cin=Cin, Cout=32, KH=3, KW=3,
                         head_dims={"head_a": 10, "head_b": 5})

    ref = reference_forward(x, params)

    # f32 path (default): exact-semantics parity with the PyTorch forward.
    fwd = jax.jit(functools.partial(multi_output_net_forward, params=params))
    out = fwd(x)
    out = jax.tree_util.tree_map(jax.block_until_ready, out)
    assert out["head_a"].shape == (N, 10)
    assert out["head_b"].shape == (N, 5)
    for name in out:
        assert jnp.allclose(out[name], ref[name], rtol=2e-3, atol=2e-3), name

    # bf16-streaming path (halves HBM bytes of the dominant operand; f32 accumulate).
    # TODO(synk): make bf16 the default on v6e/v7x once per-model tolerances are signed off.
    fwd_bf16 = jax.jit(functools.partial(multi_output_net_forward, params=params,
                                         conv_dtype=jnp.bfloat16))
    out_bf16 = fwd_bf16(x)
    out_bf16 = jax.tree_util.tree_map(jax.block_until_ready, out_bf16)
    for name in out_bf16:
        assert jnp.allclose(out_bf16[name], ref[name], rtol=2e-2, atol=2e-2), name

    print("KERNEL_OK")
</pallas_src>

<mosaic_0001>
module attributes {stable_mosaic.version = 11 : i64} {
  func.func @_fused_kernel(%arg0: i32, %arg1: memref<2x18x72xf32, #tpu.memory_space<vmem>>, %arg2: memref<576x512xf32, #tpu.memory_space<vmem>>, %arg3: memref<1x512xf32, #tpu.memory_space<vmem>>, %arg4: memref<512x128xf32, #tpu.memory_space<vmem>>, %arg5: memref<1x128xf32, #tpu.memory_space<vmem>>, %arg6: memref<2x128xf32, #tpu.memory_space<vmem>>) attributes {dimension_semantics = [#tpu.dimension_semantics<parallel>], iteration_bounds = array<i64: 1>, scalar_prefetch = 0 : i64, scratch_operands = 0 : i64, tpu.core_type = #tpu.core_type<tc>, window_params = [{transform_indices = @transform_0, window_bounds = array<i64: 2, 18, 72>}, {pipeline_mode = #tpu.pipeline_mode<synchronous>, transform_indices = @transform_1, window_bounds = array<i64: 576, 512>}, {pipeline_mode = #tpu.pipeline_mode<synchronous>, transform_indices = @transform_2, window_bounds = array<i64: 1, 512>}, {pipeline_mode = #tpu.pipeline_mode<synchronous>, transform_indices = @transform_3, window_bounds = array<i64: 512, 128>}, {pipeline_mode = #tpu.pipeline_mode<synchronous>, transform_indices = @transform_4, window_bounds = array<i64: 1, 128>}, {transform_indices = @transform_5, window_bounds = array<i64: 2, 128>}]} {
    %c0 = arith.constant 0 : index
    %c0_0 = arith.constant 0 : index
    %c0_1 = arith.constant 0 : index
    %0 = vector.load %arg1[%c0, %c0_0, %c0_1] : memref<2x18x72xf32, #tpu.memory_space<vmem>>, vector<2x16x64xf32>
    %c0_2 = arith.constant 0 : index
    %c0_3 = arith.constant 0 : index
    %c4 = arith.constant 4 : index
    %1 = vector.load %arg1[%c0_2, %c0_3, %c4] : memref<2x18x72xf32, #tpu.memory_space<vmem>>, vector<2x16x64xf32>
    %c0_4 = arith.constant 0 : index
    %c0_5 = arith.constant 0 : index
    %c8 = arith.constant 8 : index
    %2 = vector.load %arg1[%c0_4, %c0_5, %c8] : memref<2x18x72xf32, #tpu.memory_space<vmem>>, vector<2x16x64xf32>
    %c0_6 = arith.constant 0 : index
    %c1 = arith.constant 1 : index
    %c0_7 = arith.constant 0 : index
    %3 = vector.load %arg1[%c0_6, %c1, %c0_7] : memref<2x18x72xf32, #tpu.memory_space<vmem>>, vector<2x16x64xf32>
    %c0_8 = arith.constant 0 : index
    %c1_9 = arith.constant 1 : index
    %c4_10 = arith.constant 4 : index
    %4 = vector.load %arg1[%c0_8, %c1_9, %c4_10] : memref<2x18x72xf32, #tpu.memory_space<vmem>>, vector<2x16x64xf32>
    %c0_11 = arith.constant 0 : index
    %c1_12 = arith.constant 1 : index
    %c8_13 = arith.constant 8 : index
    %5 = vector.load %arg1[%c0_11, %c1_12, %c8_13] : memref<2x18x72xf32, #tpu.memory_space<vmem>>, vector<2x16x64xf32>
    %c0_14 = arith.constant 0 : index
    %c2 = arith.constant 2 : index
    %c0_15 = arith.constant 0 : index
    %6 = vector.load %arg1[%c0_14, %c2, %c0_15] : memref<2x18x72xf32, #tpu.memory_space<vmem>>, vector<2x16x64xf32>
    %c0_16 = arith.constant 0 : index
    %c2_17 = arith.constant 2 : index
    %c4_18 = arith.constant 4 : index
    %7 = vector.load %arg1[%c0_16, %c2_17, %c4_18] : memref<2x18x72xf32, #tpu.memory_space<vmem>>, vector<2x16x64xf32>
    %c0_19 = arith.constant 0 : index
    %c2_20 = arith.constant 2 : index
    %c8_21 = arith.constant 8 : index
    %8 = vector.load %arg1[%c0_19, %c2_20, %c8_21] : memref<2x18x72xf32, #tpu.memory_space<vmem>>, vector<2x16x64xf32>
    %9 = tpu.concatenate %0, %1, %2, %3, %4, %5, %6, %7, %8 in 2 : vector<2x16x64xf32>, vector<2x16x64xf32>, vector<2x16x64xf32>, vector<2x16x64xf32>, vector<2x16x64xf32>, vector<2x16x64xf32>, vector<2x16x64xf32>, vector<2x16x64xf32>, vector<2x16x64xf32> -> vector<2x16x576xf32>
    %10 = vector.shape_cast %9 : vector<2x16x576xf32> to vector<32x576xf32>
    %c0_22 = arith.constant 0 : index
    %c0_23 = arith.constant 0 : index
    %11 = vector.load %arg2[%c0_22, %c0_23] : memref<576x512xf32, #tpu.memory_space<vmem>>, vector<576x512xf32>
    %cst = arith.constant dense<0.000000e+00> : vector<32x512xf32>
    %12 = tpu.matmul %10, %11, %cst {dimension_numbers = #tpu.dot_dimension_numbers<[1], [0], [0], [1], [0, 0, 1, 1], [], []>} : vector<32x576xf32>, vector<576x512xf32>, vector<32x512xf32> -> vector<32x512xf32>
    %c0_24 = arith.constant 0 : index
    %c0_25 = arith.constant 0 : index
    %13 = vector.load %arg3[%c0_24, %c0_25] : memref<1x512xf32, #tpu.memory_space<vmem>>, vector<1x512xf32>
    %14 = vector.broadcast %13 : vector<1x512xf32> to vector<32x512xf32>
    %15 = arith.addf %12, %14 : vector<32x512xf32>
    %cst_26 = arith.constant 0.000000e+00 : f32
    %16 = vector.broadcast %cst_26 : f32 to vector<32x512xf32>
    %17 = arith.maximumf %15, %16 : vector<32x512xf32>
    %18 = vector.shape_cast %17 : vector<32x512xf32> to vector<2x16x512xf32>
    %cst_27 = arith.constant dense<0.000000e+00> : vector<2x512xf32>
    %19 = vector.multi_reduction <add>, %18, %cst_27 [1] : vector<2x16x512xf32> to vector<2x512xf32>
    %cst_28 = arith.constant 1.600000e+01 : f32
    %20 = vector.broadcast %cst_28 : f32 to vector<2x512xf32>
    %21 = arith.divf %19, %20 : vector<2x512xf32>
    %c0_29 = arith.constant 0 : index
    %c0_30 = arith.constant 0 : index
    %22 = vector.load %arg4[%c0_29, %c0_30] : memref<512x128xf32, #tpu.memory_space<vmem>>, vector<512x128xf32>
    %cst_31 = arith.constant dense<0.000000e+00> : vector<2x128xf32>
    %23 = tpu.matmul %21, %22, %cst_31 {dimension_numbers = #tpu.dot_dimension_numbers<[1], [0], [0], [1], [0, 0, 1, 1], [], []>} : vector<2x512xf32>, vector<512x128xf32>, vector<2x128xf32> -> vector<2x128xf32>
    %c0_32 = arith.constant 0 : index
    %c0_33 = arith.constant 0 : index
    %24 = vector.load %arg5[%c0_32, %c0_33] : memref<1x128xf32, #tpu.memory_space<vmem>>, vector<1x128xf32>
    %25 = vector.broadcast %24 : vector<1x128xf32> to vector<2x128xf32>
    %26 = arith.addf %23, %25 : vector<2x128xf32>
    %c0_34 = arith.constant 0 : index
    %c0_35 = arith.constant 0 : index
    %27 = vector.load %arg6[%c0_34, %c0_35] : memref<2x128xf32, #tpu.memory_space<vmem>>, vector<2x128xf32>
    tpu.vector_store %arg6[%c0_34, %c0_35], %26 {strides = array<i32>} : memref<2x128xf32, #tpu.memory_space<vmem>>, vector<2x128xf32>,
    return
  }
  func.func @transform_0(%arg0: i32) -> (i32, i32, i32) {
    %c0_i32 = arith.constant 0 : i32
    %c0_i32_0 = arith.constant 0 : i32
    %c0_i32_1 = arith.constant 0 : i32
    return %arg0, %c0_i32, %c0_i32_0 : i32, i32, i32
  }
  func.func @transform_1(%arg0: i32) -> (i32, i32) {
    %c0_i32 = arith.constant 0 : i32
    %c0_i32_0 = arith.constant 0 : i32
    %c0_i32_1 = arith.constant 0 : i32
    return %c0_i32, %c0_i32_0 : i32, i32
  }
  func.func @transform_2(%arg0: i32) -> (i32, i32) {
    %c0_i32 = arith.constant 0 : i32
    %c0_i32_0 = arith.constant 0 : i32
    %c0_i32_1 = arith.constant 0 : i32
    return %c0_i32, %c0_i32_0 : i32, i32
  }
  func.func @transform_3(%arg0: i32) -> (i32, i32) {
    %c0_i32 = arith.constant 0 : i32
    %c0_i32_0 = arith.constant 0 : i32
    %c0_i32_1 = arith.constant 0 : i32
    return %c0_i32, %c0_i32_0 : i32, i32
  }
  func.func @transform_4(%arg0: i32) -> (i32, i32) {
    %c0_i32 = arith.constant 0 : i32
    %c0_i32_0 = arith.constant 0 : i32
    %c0_i32_1 = arith.constant 0 : i32
    return %c0_i32, %c0_i32_0 : i32, i32
  }
  func.func @transform_5(%arg0: i32) -> (i32, i32) {
    %c0_i32 = arith.constant 0 : i32
    %c0_i32_0 = arith.constant 0 : i32
    return %arg0, %c0_i32 : i32, i32
  }
}

</mosaic_0001>

<bundles_post_ra>
// kernel: tile.11
= control target key start
LH: loop header
LB: loop body
LE: loop exit
PB: predicated region body
PF: predicated region fallthrough
CT: control target
= control target key end

     0   :  { %s28_s0 = inlined_call_operand.vmem [shape: f32[32], index: 0, kind: input, shape index: {}]   ;;  %s29_s1 = inlined_call_operand.vmem [shape: f32[16,32], index: 1, kind: output, shape index: {}]  }
   0x1   :  { %v4_v0 = vld [vmem:[%s28_s0] ss:$0 sm:$0xff] }
   0x2   :  { %5 = vst [vmem:[%s29_s1] sm:$0xff] %v4_v0  ;;  %8 = vst [vmem:[%s29_s1 + $0x8] sm:$0xff] %v4_v0 }

// kernel: tile.12
= control target key start
LH: loop header
LB: loop body
LE: loop exit
PB: predicated region body
PF: predicated region fallthrough
CT: control target
= control target key end

     0   :  { %s62_s8 = smov 96   ;;  %vm3_vm0 = vcmask 261120   ;;  %s64_s15 = smov 64   ;;  %vm9_vm1 = vcmask 1048320   ;;  %vm15_vm2 = vcmask 785920   ;;  %vm21_vm3 = vcmask 523520   ;;  %s99_s0 = inlined_call_operand.vmem [shape: f32[16,32], index: 0, kind: input, shape index: {}]   ;;  %s100_s1 = inlined_call_operand.vmem [shape: f32[1,512], index: 1, kind: output, shape index: {}]  }
   0x1   :  { %v53_v0 = vld [vmem:[%s99_s0 + $0x3] ss:$4 sm:$0xf]   ;;  %v54_v1 = vld [vmem:[%s99_s0 + $0x2] ss:$4 sm:$0xf]  }
   0x2   :  { %7 = vrot.lane.b32.xlu0 %v53_v0, %s62_s8  ;;  %v55_v2 = vld [vmem:[%s99_s0 + $0x1] ss:$4 sm:$0xf]   ;;  %v2_v3 = vld [vmem:[%s99_s0] ss:$4 sm:$0xf]  }
   0x3   :  { %s63_s0 = smov 32   ;;  %4 = vst.msk [vmem:[#allocation0] ss:$8 sm:$0xf] %vm3_vm0, %v2_v3  }
   0x4   :  { %19 = vrot.lane.b32.xlu1 %v55_v2, %s63_s0 }
   0x6   :  { %13 = vrot.lane.b32.xlu0 %v54_v1, %s64_s15 }
  0x74   :  { %v8_v4 = vpop.permute.xlu0 %7  }
  0x75   :  { %10 = vst.msk [vmem:[#allocation0] ss:$8 sm:$0xf] %vm9_vm1, %v8_v4  }
  0x76   :  { %v20_v5 = vpop.permute.xlu1 %19  }
  0x78   :  { %v14_v6 = vpop.permute.xlu0 %13  }
  0x79   :  { %16 = vst.msk [vmem:[#allocation0] ss:$8 sm:$0xf] %vm15_vm2, %v14_v6  }
  0x7a   :  { %22 = vst.msk [vmem:[#allocation0] ss:$8 sm:$0xf] %vm21_vm3, %v20_v5  }
  0x81   :  { %v27_v7 = vld [vmem:[#allocation0] sm:$0x1]  ;;  %v32_v8 = vld [vmem:[#allocation0 + $0x8] sm:$0x1]  ;;  %v38_v9 = vld [vmem:[#allocation0 + $0x10] sm:$0x1] }
  0x82   :  { %30 = vst [vmem:[%s100_s1] sm:$0x1] %v27_v7  ;;  %56 = vst [vmem:[%s100_s1 + $0x1] sm:$0x1] %v32_v8  ;;  %v45_v10 = vld [vmem:[#allocation0 + $0x18] sm:$0x1] }
  0x83   :  { %57 = vst [vmem:[%s100_s1 + $0x2] sm:$0x1] %v38_v9  ;;  %58 = vst [vmem:[%s100_s1 + $0x3] sm:$0x1] %v45_v10 }

// kernel: multi_output_net_forward.1
= control target key start
LH: loop header
LB: loop body
LE: loop exit
PB: predicated region body
PF: predicated region fallthrough
CT: control target
= control target key end

     0   :  { %s1422_s28 = smov 60   ;;  %s1423_s29 = smov 120   ;;  %vm124_vm0 = vcmask 523264   ;;  %vm1153_vm1 = vcmask 1041409   ;;  %s2764_s0 = inlined_call_operand.vmem [shape: f32[2,18,72], index: 0, kind: input, shape index: {}]   ;;  %s2765_s1 = inlined_call_operand.vmem [shape: f32[576,512], index: 1, kind: input, shape index: {}]   ;;  %s2766_s3 = inlined_call_operand.vmem [shape: f32[512,128], index: 3, kind: input, shape index: {}]   ;;  %s2767_s2 = inlined_call_operand.vmem [shape: f32[1,512], index: 2, kind: input, shape index: {}]   ;;  %s2768_s4 = inlined_call_operand.vmem [shape: f32[1,128], index: 4, kind: input, shape index: {}]   ;;  %s2769_s5 = inlined_call_operand.vmem [shape: f32[2,128], index: 5, kind: output, shape index: {}]  }
   0x1   :  { %v1461_v0 = vld [vmem:[%s2764_s0] sm:$0xff]  ;;  %v1471_v2 = vld [vmem:[%s2764_s0 + $0x8] sm:$0xff]  ;;  %s1424_s21 = smov 124   ;;  %s1425_s22 = smov 64   ;;  %v1523_v18 = vld [vmem:[%s2764_s0 + $0x18] sm:$0xff] }
   0x2   :  { %v1466_v1 = vld [vmem:[%s2764_s0 + $0x2] sm:$0xff]  ;;  %v1392_v4 = vpack.i.bf16 %v1471_v2, %v1461_v0  ;;  %s1426_s16 = smov 56   ;;  %v1556_v27 = vld [vmem:[%s2764_s0 + $0x19] sm:$0xff]  ;;  %v1609_v41 = vld [vmem:[%s2764_s0 + $0xa] sm:$0xff] }
   0x3   :  { %v1402_v3 = vpack.i.bf16 %v1466_v1, %v1461_v0  ;;  %v24_v5 = vld [vmem:[%s2764_s0 + $0x1] sm:$0xff]  ;;  %v1483_v6 = vld [vmem:[%s2764_s0 + $0x9] sm:$0xff] }
   0x4   :  { %1393 = vrot.lane.b32.xlu0 %v1392_v4, %s1423_s29  ;;  %v1397_v7 = vpack.i.bf16 %v1483_v6, %v24_v5  ;;  %v202_v8 = vld [vmem:[%s2765_s1 + $0x1e8] sm:$0xff]  ;;  %v201_v10 = vld [vmem:[%s2765_s1 + $0x1e0] sm:$0xff]  ;;  %v1417_v47 = vpack.i.bf16 %v1556_v27, %v1483_v6 }
   0x5   :  { %1403 = vrot.lane.b32.xlu1 %v1402_v3, %s1422_s28  ;;  %v330_v9 = vld [vmem:[%s2765_s1 + $0x5e8] sm:$0xff]  ;;  %459 = vmatprep.subr.mxu0 %v202_v8  ;;  %v329_v11 = vld [vmem:[%s2765_s1 + $0x5e0] sm:$0xff] }
   0x6   :  { %548 = vmatprep.subr.mxu1 %v330_v9  ;;  %v198_v12 = vld [vmem:[%s2765_s1 + $0x1c8] sm:$0xff]  ;;  %460 = vmatpush1.msra.mxu0 %v201_v10  ;;  %v197_v14 = vld [vmem:[%s2765_s1 + $0x1c0] sm:$0xff] }
   0x7   :  { %549 = vmatpush1.msra.mxu1 %v329_v11  ;;  %v326_v13 = vld [vmem:[%s2765_s1 + $0x5c8] sm:$0xff]  ;;  %v325_v15 = vld [vmem:[%s2765_s1 + $0x5c0] sm:$0xff]  ;;  %461 = vmatprep.subr.mxu0 %v198_v12 }
   0x8   :  { %1398 = vrot.lane.b32.xlu0 %v1397_v7, %s1425_s22  ;;  %v194_v16 = vld [vmem:[%s2765_s1 + $0x1a8] sm:$0xff]  ;;  %v1528_v19 = vld [vmem:[%s2764_s0 + $0x20] sm:$0xff]  ;;  %550 = vmatprep.subr.mxu1 %v326_v13 }
   0x9   :  { %76 = vrot.lane.b32.xlu1 %v24_v5, %s1424_s21  ;;  %v322_v17 = vld [vmem:[%s2765_s1 + $0x5a8] sm:$0xff]  ;;  %462 = vmatpush1.msra.mxu0 %v197_v14  ;;  %v193_v20 = vld [vmem:[%s2765_s1 + $0x1a0] sm:$0xff]  ;;  %v1407_v24 = vpack.i.bf16 %v1528_v19, %v1523_v18 }
   0xa   :  { %551 = vmatpush1.msra.mxu1 %v325_v15  ;;  %v321_v21 = vld [vmem:[%s2765_s1 + $0x5a0] sm:$0xff]  ;;  %463 = vmatprep.subr.mxu0 %v194_v16  ;;  %v190_v22 = vld [vmem:[%s2765_s1 + $0x188] sm:$0xff] }
   0xb   :  { %552 = vmatprep.subr.mxu1 %v322_v17  ;;  %v318_v23 = vld [vmem:[%s2765_s1 + $0x588] sm:$0xff]  ;;  %v189_v25 = vld [vmem:[%s2765_s1 + $0x180] sm:$0xff]  ;;  %464 = vmatpush1.msra.mxu0 %v193_v20 }
   0xc   :  { %88 = vrot.lane.b32.xlu0 %v24_v5, %s1426_s16  ;;  %v317_v26 = vld [vmem:[%s2765_s1 + $0x580] sm:$0xff]  ;;  %553 = vmatpush1.msra.mxu1 %v321_v21  ;;  %v186_v28 = vld [vmem:[%s2765_s1 + $0x168] sm:$0xff] }
   0xd   :  { %38 = vrot.lane.b32.xlu1 %v1471_v2, %s1422_s28  ;;  %465 = vmatprep.subr.mxu0 %v190_v22  ;;  %v314_v29 = vld [vmem:[%s2765_s1 + $0x568] sm:$0xff]  ;;  %v185_v30 = vld [vmem:[%s2765_s1 + $0x160] sm:$0xff] }
   0xe   :  { %554 = vmatprep.subr.mxu1 %v318_v23  ;;  %466 = vmatpush1.msra.mxu0 %v189_v25  ;;  %v313_v31 = vld [vmem:[%s2765_s1 + $0x560] sm:$0xff]  ;;  %v182_v32 = vld [vmem:[%s2765_s1 + $0x148] sm:$0xff] }
   0xf   :  { %555 = vmatpush1.msra.mxu1 %v317_v26  ;;  %v310_v33 = vld [vmem:[%s2765_s1 + $0x548] sm:$0xff]  ;;  %467 = vmatprep.subr.mxu0 %v186_v28  ;;  %v181_v35 = vld [vmem:[%s2765_s1 + $0x140] sm:$0xff] }
  0x10   :  { %1408 = vrot.lane.b32.xlu0 %v1407_v24, %s1423_s29  ;;  %v1582_v34 = vld [vmem:[%s2764_s0 + $0x21] sm:$0xff]  ;;  %556 = vmatprep.subr.mxu1 %v314_v29 }
  0x11   :  { %68 = vrot.lane.b32.xlu1 %v1556_v27, %s1425_s22  ;;  %468 = vmatpush1.msra.mxu0 %v185_v30  ;;  %v309_v36 = vld [vmem:[%s2765_s1 + $0x540] sm:$0xff]  ;;  %v178_v37 = vld [vmem:[%s2765_s1 + $0x128] sm:$0xff] }
  0x12   :  { %557 = vmatpush1.msra.mxu1 %v313_v31  ;;  %469 = vmatprep.subr.mxu0 %v182_v32  ;;  %v306_v38 = vld [vmem:[%s2765_s1 + $0x528] sm:$0xff]  ;;  %v177_v39 = vld [vmem:[%s2765_s1 + $0x120] sm:$0xff] }
  0x13   :  { %558 = vmatprep.subr.mxu1 %v310_v33  ;;  %v305_v40 = vld [vmem:[%s2765_s1 + $0x520] sm:$0xff]  ;;  %470 = vmatpush1.msra.mxu0 %v181_v35  ;;  %v174_v43 = vld [vmem:[%s2765_s1 + $0x108] sm:$0xff] }
  0x14   :  { %40 = vrot.lane.b32.xlu0 %v1523_v18, %s1422_s28  ;;  %v1614_v42 = vld [vmem:[%s2764_s0 + $0x1a] sm:$0xff]  ;;  %559 = vmatpush1.msra.mxu1 %v309_v36  ;;  %v302_v44 = vld [vmem:[%s2765_s1 + $0x508] sm:$0xff] }
  0x15   :  { %70 = vrot.lane.b32.xlu1 %v1582_v34, %s1425_s22  ;;  %471 = vmatprep.subr.mxu0 %v178_v37  ;;  %v173_v45 = vld [vmem:[%s2765_s1 + $0x100] sm:$0xff]  ;;  %v1412_v48 = vpack.i.bf16 %v1614_v42, %v1609_v41  ;;  %v170_v49 = vld [vmem:[%s2765_s1 + $0xe8] sm:$0xff] }
  0x16   :  { %560 = vmatprep.subr.mxu1 %v306_v38  ;;  %472 = vmatpush1.msra.mxu0 %v177_v39  ;;  %v301_v46 = vld [vmem:[%s2765_s1 + $0x500] sm:$0xff]  ;;  %v298_v50 = vld [vmem:[%s2765_s1 + $0x4e8] sm:$0xff] }
  0x17   :  { %561 = vmatpush1.msra.mxu1 %v305_v40  ;;  %473 = vmatprep.subr.mxu0 %v174_v43  ;;  %v169_v51 = vld [vmem:[%s2765_s1 + $0xe0] sm:$0xff]  ;;  %v166_v53 = vld [vmem:[%s2765_s1 + $0xc8] sm:$0xff] }
  0x18   :  { %42 = vrot.lane.b32.xlu0 %v1528_v19, %s1422_s28  ;;  %562 = vmatprep.subr.mxu1 %v302_v44  ;;  %v297_v52 = vld [vmem:[%s2765_s1 + $0x4e0] sm:$0xff]  ;;  %v294_v54 = vld [vmem:[%s2765_s1 + $0x4c8] sm:$0xff] }
  0x19   :  { %116 = vrot.lane.b32.xlu1 %v1466_v1, %s1423_s29  ;;  %474 = vmatpush1.msra.mxu0 %v173_v45  ;;  %v165_v55 = vld [vmem:[%s2765_s1 + $0xc0] sm:$0xff]  ;;  %v162_v57 = vld [vmem:[%s2765_s1 + $0xa8] sm:$0xff] }
  0x1a   :  { %563 = vmatpush1.msra.mxu1 %v301_v46  ;;  %475 = vmatprep.subr.mxu0 %v170_v49  ;;  %v293_v56 = vld [vmem:[%s2765_s1 + $0x4c0] sm:$0xff]  ;;  %v290_v58 = vld [vmem:[%s2765_s1 + $0x4a8] sm:$0xff] }
  0x1b   :  { %564 = vmatprep.subr.mxu1 %v298_v50  ;;  %476 = vmatpush1.msra.mxu0 %v169_v51  ;;  %v161_v59 = vld [vmem:[%s2765_s1 + $0xa0] sm:$0xff]  ;;  %v158_v61 = vld [vmem:[%s2765_s1 + $0x88] sm:$0xff] }
  0x1c   :  { %1413 = vrot.lane.b32.xlu0 %v1412_v48, %s1422_s28  ;;  %565 = vmatpush1.msra.mxu1 %v297_v52  ;;  %v289_v60 = vld [vmem:[%s2765_s1 + $0x4a0] sm:$0xff]  ;;  %v286_v62 = vld [vmem:[%s2765_s1 + $0x488] sm:$0xff] }
  0x1d   :  { %1418 = vrot.lane.b32.xlu1 %v1417_v47, %s1424_s21  ;;  %477 = vmatprep.subr.mxu0 %v166_v53  ;;  %v1687_v63 = vld [vmem:[%s2764_s0 + $0x22] sm:$0xff] }
  0x1e   :  { %566 = vmatprep.subr.mxu1 %v294_v54  ;;  %478 = vmatpush1.msra.mxu0 %v165_v55  ;;  %v157_v3 = vld [vmem:[%s2765_s1 + $0x80] sm:$0xff]  ;;  %v154_v5 = vld [vmem:[%s2765_s1 + $0x68] sm:$0xff] }
  0x1f   :  { %567 = vmatpush1.msra.mxu1 %v293_v56  ;;  %479 = vmatprep.subr.mxu0 %v162_v57  ;;  %v285_v4 = vld [vmem:[%s2765_s1 + $0x480] sm:$0xff]  ;;  %v150_v9 = vld [vmem:[%s2765_s1 + $0x48] sm:$0xff] }
  0x20   :  { %90 = vrot.lane.b32.xlu0 %v1483_v6, %s1426_s16  ;;  %568 = vmatprep.subr.mxu1 %v290_v58  ;;  %v282_v6 = vld [vmem:[%s2765_s1 + $0x468] sm:$0xff]  ;;  %v153_v7 = vld [vmem:[%s2765_s1 + $0x60] sm:$0xff] }
  0x21   :  { %92 = vrot.lane.b32.xlu1 %v1556_v27, %s1426_s16  ;;  %480 = vmatpush1.msra.mxu0 %v161_v59  ;;  %v281_v8 = vld [vmem:[%s2765_s1 + $0x460] sm:$0xff]  ;;  %v278_v10 = vld [vmem:[%s2765_s1 + $0x448] sm:$0xff] }
  0x22   :  { %569 = vmatpush1.msra.mxu1 %v289_v60  ;;  %481 = vmatprep.subr.mxu0 %v158_v61  ;;  %v149_v11 = vld [vmem:[%s2765_s1 + $0x40] sm:$0xff]  ;;  %v146_v13 = vld [vmem:[%s2765_s1 + $0x28] sm:$0xff] }
  0x23   :  { %570 = vmatprep.subr.mxu1 %v286_v62  ;;  %482 = vmatpush1.msra.mxu0 %v157_v3  ;;  %v277_v12 = vld [vmem:[%s2765_s1 + $0x440] sm:$0xff]  ;;  %v274_v14 = vld [vmem:[%s2765_s1 + $0x428] sm:$0xff] }
  0x24   :  { %110 = vrot.lane.b32.xlu0 %v1687_v63, %s1422_s28  ;;  %571 = vmatpush1.msra.mxu1 %v285_v4  ;;  %v145_v15 = vld [vmem:[%s2765_s1 + $0x20] sm:$0xff]  ;;  %v142_v17 = vld [vmem:[%s2765_s1 + $0x8] sm:$0xff] }
  0x25   :  { %82 = vrot.lane.b32.xlu1 %v1582_v34, %s1424_s21  ;;  %483 = vmatprep.subr.mxu0 %v154_v5  ;;  %v273_v16 = vld [vmem:[%s2765_s1 + $0x420] sm:$0xff]  ;;  %v270_v20 = vld [vmem:[%s2765_s1 + $0x408] sm:$0xff] }
  0x26   :  { %572 = vmatprep.subr.mxu1 %v282_v6  ;;  %484 = vmatpush1.msra.mxu0 %v153_v7  ;;  %v141_v21 = vld [vmem:[%s2765_s1] sm:$0xff]  ;;  %v266_v23 = vld [vmem:[%s2765_s1 + $0x3e8] sm:$0xff] }
  0x27   :  { %573 = vmatpush1.msra.mxu1 %v281_v8  ;;  %485 = vmatprep.subr.mxu0 %v150_v9  ;;  %v269_v22 = vld [vmem:[%s2765_s1 + $0x400] sm:$0xff]  ;;  %v394_v24 = vld [vmem:[%s2765_s1 + $0x7e8] sm:$0xff] }
  0x28   :  { %94 = vrot.lane.b32.xlu0 %v1582_v34, %s1426_s16  ;;  %574 = vmatprep.subr.mxu1 %v278_v10  ;;  %v265_v25 = vld [vmem:[%s2765_s1 + $0x3e0] sm:$0xff]  ;;  %v262_v27 = vld [vmem:[%s2765_s1 + $0x3c8] sm:$0xff] }
  0x29   :  { %118 = vrot.lane.b32.xlu1 %v1609_v41, %s1423_s29  ;;  %486 = vmatpush1.msra.mxu0 %v149_v11  ;;  %v393_v26 = vld [vmem:[%s2765_s1 + $0x7e0] sm:$0xff]  ;;  %v390_v28 = vld [vmem:[%s2765_s1 + $0x7c8] sm:$0xff] }
  0x2a   :  { %575 = vmatpush1.msra.mxu1 %v277_v12  ;;  %487 = vmatprep.subr.mxu0 %v146_v13  ;;  %v261_v29 = vld [vmem:[%s2765_s1 + $0x3c0] sm:$0xff]  ;;  %v258_v31 = vld [vmem:[%s2765_s1 + $0x3a8] sm:$0xff] }
  0x2b   :  { %576 = vmatprep.subr.mxu1 %v274_v14  ;;  %488 = vmatpush1.msra.mxu0 %v145_v15  ;;  %v389_v30 = vld [vmem:[%s2765_s1 + $0x7c0] sm:$0xff]  ;;  %v386_v32 = vld [vmem:[%s2765_s1 + $0x7a8] sm:$0xff] }
  0x2c   :  { %120 = vrot.lane.b32.xlu0 %v1614_v42, %s1423_s29  ;;  %577 = vmatpush1.msra.mxu1 %v273_v16  ;;  %v257_v33 = vld [vmem:[%s2765_s1 + $0x3a0] sm:$0xff]  ;;  %v254_v35 = vld [vmem:[%s2765_s1 + $0x388] sm:$0xff] }
  0x2d   :  { %122 = vrot.lane.b32.xlu1 %v1687_v63, %s1423_s29  ;;  %489 = vmatprep.subr.mxu0 %v142_v17  ;;  %v385_v34 = vld [vmem:[%s2765_s1 + $0x7a0] sm:$0xff]  ;;  %v382_v36 = vld [vmem:[%s2765_s1 + $0x788] sm:$0xff] }
  0x2e   :  { %578 = vmatprep.subr.mxu1 %v270_v20  ;;  %490 = vmatpush1.msra.mxu0 %v141_v21  ;;  %v253_v37 = vld [vmem:[%s2765_s1 + $0x380] sm:$0xff]  ;;  %v250_v39 = vld [vmem:[%s2765_s1 + $0x368] sm:$0xff] }
  0x2f   :  { %579 = vmatpush1.msra.mxu1 %v269_v22  ;;  %491 = vmatprep.subr.mxu0 %v266_v23  ;;  %v381_v38 = vld [vmem:[%s2765_s1 + $0x780] sm:$0xff]  ;;  %v378_v40 = vld [vmem:[%s2765_s1 + $0x768] sm:$0xff] }
  0x30   :  { %580 = vmatprep.subr.mxu1 %v394_v24  ;;  %492 = vmatpush2.msra.mxu0 %v265_v25  ;;  %v249_v43 = vld [vmem:[%s2765_s1 + $0x360] sm:$0xff]  ;;  %v246_v45 = vld [vmem:[%s2765_s1 + $0x348] sm:$0xff] }
  0x31   :  { %581 = vmatpush2.msra.mxu1 %v393_v26  ;;  %493 = vmatprep.subr.mxu0 %v262_v27  ;;  %v377_v44 = vld [vmem:[%s2765_s1 + $0x760] sm:$0xff]  ;;  %v374_v46 = vld [vmem:[%s2765_s1 + $0x748] sm:$0xff] }
  0x32   :  { %582 = vmatprep.subr.mxu1 %v390_v28  ;;  %494 = vmatpush2.msra.mxu0 %v261_v29  ;;  %v245_v47 = vld [vmem:[%s2765_s1 + $0x340] sm:$0xff]  ;;  %v242_v49 = vld [vmem:[%s2765_s1 + $0x328] sm:$0xff] }
  0x33   :  { %583 = vmatpush2.msra.mxu1 %v389_v30  ;;  %495 = vmatprep.subr.mxu0 %v258_v31  ;;  %v373_v48 = vld [vmem:[%s2765_s1 + $0x740] sm:$0xff]  ;;  %v370_v50 = vld [vmem:[%s2765_s1 + $0x728] sm:$0xff] }
  0x34   :  { %584 = vmatprep.subr.mxu1 %v386_v32  ;;  %496 = vmatpush2.msra.mxu0 %v257_v33  ;;  %v241_v51 = vld [vmem:[%s2765_s1 + $0x320] sm:$0xff]  ;;  %v238_v53 = vld [vmem:[%s2765_s1 + $0x308] sm:$0xff]  ;;  %v204_v32 = vld [vmem:[%s2765_s1 + $0x1f8] sm:$0xff] }
  0x35   :  { %585 = vmatpush2.msra.mxu1 %v385_v34  ;;  %497 = vmatprep.subr.mxu0 %v254_v35  ;;  %v369_v52 = vld [vmem:[%s2765_s1 + $0x720] sm:$0xff]  ;;  %v366_v54 = vld [vmem:[%s2765_s1 + $0x708] sm:$0xff] }
  0x36   :  { %586 = vmatprep.subr.mxu1 %v382_v36  ;;  %498 = vmatpush2.msra.mxu0 %v253_v37  ;;  %v237_v55 = vld [vmem:[%s2765_s1 + $0x300] sm:$0xff]  ;;  %v234_v57 = vld [vmem:[%s2765_s1 + $0x2e8] sm:$0xff] }
  0x37   :  { %587 = vmatpush2.msra.mxu1 %v381_v38  ;;  %499 = vmatprep.subr.mxu0 %v250_v39  ;;  %v365_v56 = vld [vmem:[%s2765_s1 + $0x700] sm:$0xff]  ;;  %v362_v58 = vld [vmem:[%s2765_s1 + $0x6e8] sm:$0xff] }
  0x38   :  { %588 = vmatprep.subr.mxu1 %v378_v40  ;;  %500 = vmatpush2.msra.mxu0 %v249_v43  ;;  %v233_v59 = vld [vmem:[%s2765_s1 + $0x2e0] sm:$0xff]  ;;  %v230_v61 = vld [vmem:[%s2765_s1 + $0x2c8] sm:$0xff] }
  0x39   :  { %589 = vmatpush2.msra.mxu1 %v377_v44  ;;  %501 = vmatprep.subr.mxu0 %v246_v45  ;;  %v361_v60 = vld [vmem:[%s2765_s1 + $0x6e0] sm:$0xff]  ;;  %v358_v62 = vld [vmem:[%s2765_s1 + $0x6c8] sm:$0xff] }
  0x3a   :  { %590 = vmatprep.subr.mxu1 %v374_v46  ;;  %502 = vmatpush2.msra.mxu0 %v245_v47  ;;  %v229_v3 = vld [vmem:[%s2765_s1 + $0x2c0] sm:$0xff]  ;;  %v226_v5 = vld [vmem:[%s2765_s1 + $0x2a8] sm:$0xff] }
  0x3b   :  { %591 = vmatpush2.msra.mxu1 %v373_v48  ;;  %503 = vmatprep.subr.mxu0 %v242_v49  ;;  %v357_v4 = vld [vmem:[%s2765_s1 + $0x6c0] sm:$0xff]  ;;  %v354_v6 = vld [vmem:[%s2765_s1 + $0x6a8] sm:$0xff] }
  0x3c   :  { %592 = vmatprep.subr.mxu1 %v370_v50  ;;  %504 = vmatpush2.msra.mxu0 %v241_v51  ;;  %v225_v7 = vld [vmem:[%s2765_s1 + $0x2a0] sm:$0xff]  ;;  %v222_v9 = vld [vmem:[%s2765_s1 + $0x288] sm:$0xff]  ;;  %v203_v50 = vld [vmem:[%s2765_s1 + $0x1f0] sm:$0xff] }
  0x3d   :  { %593 = vmatpush2.msra.mxu1 %v369_v52  ;;  %505 = vmatprep.subr.mxu0 %v238_v53  ;;  %v353_v8 = vld [vmem:[%s2765_s1 + $0x6a0] sm:$0xff]  ;;  %v350_v10 = vld [vmem:[%s2765_s1 + $0x688] sm:$0xff]  ;;  %v200_v53 = vld [vmem:[%s2765_s1 + $0x1d8] sm:$0xff] }
  0x3e   :  { %594 = vmatprep.subr.mxu1 %v366_v54  ;;  %506 = vmatpush2.msra.mxu0 %v237_v55  ;;  %v221_v11 = vld [vmem:[%s2765_s1 + $0x280] sm:$0xff]  ;;  %v218_v13 = vld [vmem:[%s2765_s1 + $0x268] sm:$0xff]  ;;  %v199_v54 = vld [vmem:[%s2765_s1 + $0x1d0] sm:$0xff] }
  0x3f   :  { %595 = vmatpush2.msra.mxu1 %v365_v56  ;;  %507 = vmatprep.subr.mxu0 %v234_v57  ;;  %v349_v12 = vld [vmem:[%s2765_s1 + $0x680] sm:$0xff]  ;;  %v346_v14 = vld [vmem:[%s2765_s1 + $0x668] sm:$0xff] }
  0x40   :  { %596 = vmatprep.subr.mxu1 %v362_v58  ;;  %508 = vmatpush2.msra.mxu0 %v233_v59  ;;  %v217_v15 = vld [vmem:[%s2765_s1 + $0x260] sm:$0xff]  ;;  %v214_v17 = vld [vmem:[%s2765_s1 + $0x248] sm:$0xff] }
  0x41   :  { %597 = vmatpush2.msra.mxu1 %v361_v60  ;;  %509 = vmatprep.subr.mxu0 %v230_v61  ;;  %v345_v16 = vld [vmem:[%s2765_s1 + $0x660] sm:$0xff]  ;;  %v342_v20 = vld [vmem:[%s2765_s1 + $0x648] sm:$0xff]  ;;  %v196_v60 = vld [vmem:[%s2765_s1 + $0x1b8] sm:$0xff] }
  0x42   :  { %598 = vmatprep.subr.mxu1 %v358_v62  ;;  %510 = vmatpush2.msra.mxu0 %v229_v3  ;;  %v213_v21 = vld [vmem:[%s2765_s1 + $0x240] sm:$0xff]  ;;  %v210_v23 = vld [vmem:[%s2765_s1 + $0x228] sm:$0xff] }
  0x43   :  { %599 = vmatpush2.msra.mxu1 %v357_v4  ;;  %511 = vmatprep.subr.mxu0 %v226_v5  ;;  %v341_v22 = vld [vmem:[%s2765_s1 + $0x640] sm:$0xff]  ;;  %v338_v24 = vld [vmem:[%s2765_s1 + $0x628] sm:$0xff]  ;;  %v192_v4 = vld [vmem:[%s2765_s1 + $0x198] sm:$0xff] }
  0x44   :  { %600 = vmatprep.subr.mxu1 %v354_v6  ;;  %512 = vmatpush2.msra.mxu0 %v225_v7  ;;  %v209_v25 = vld [vmem:[%s2765_s1 + $0x220] sm:$0xff]  ;;  %v206_v27 = vld [vmem:[%s2765_s1 + $0x208] sm:$0xff]  ;;  %v191_v5 = vld [vmem:[%s2765_s1 + $0x190] sm:$0xff] }
  0x45   :  { %601 = vmatpush2.msra.mxu1 %v353_v8  ;;  %513 = vmatprep.subr.mxu0 %v222_v9  ;;  %v337_v26 = vld [vmem:[%s2765_s1 + $0x620] sm:$0xff]  ;;  %v334_v28 = vld [vmem:[%s2765_s1 + $0x608] sm:$0xff] }
  0x46   :  { %602 = vmatprep.subr.mxu1 %v350_v10  ;;  %514 = vmatpush2.msra.mxu0 %v221_v11  ;;  %v205_v29 = vld [vmem:[%s2765_s1 + $0x200] sm:$0xff]  ;;  %v426_v31 = vld [vmem:[%s2765_s1 + $0x8e8] sm:$0xff] }
  0x47   :  { %603 = vmatpush2.msra.mxu1 %v349_v12  ;;  %515 = vmatprep.subr.mxu0 %v218_v13  ;;  %v333_v30 = vld [vmem:[%s2765_s1 + $0x600] sm:$0xff]  ;;  %v418_v57 = vld [vmem:[%s2765_s1 + $0x8a8] sm:$0xff]  ;;  %v188_v12 = vld [vmem:[%s2765_s1 + $0x178] sm:$0xff] }
  0x48   :  { %604 = vmatprep.subr.mxu1 %v346_v14  ;;  %516 = vmatpush2.msra.mxu0 %v217_v15  ;;  %v425_v49 = vld [vmem:[%s2765_s1 + $0x8e0] sm:$0xff]  ;;  %v414_v3 = vld [vmem:[%s2765_s1 + $0x888] sm:$0xff]  ;;  %v187_v14 = vld [vmem:[%s2765_s1 + $0x170] sm:$0xff] }
  0x49   :  { %605 = vmatpush2.msra.mxu1 %v345_v16  ;;  %517 = vmatprep.subr.mxu0 %v214_v17  ;;  %v421_v55 = vld [vmem:[%s2765_s1 + $0x8c0] sm:$0xff]  ;;  %v410_v11 = vld [vmem:[%s2765_s1 + $0x868] sm:$0xff]  ;;  %v184_v17 = vld [vmem:[%s2765_s1 + $0x158] sm:$0xff] }
  0x4a   :  { %606 = vmatprep.subr.mxu1 %v342_v20  ;;  %518 = vmatpush2.msra.mxu0 %v213_v21  ;;  %v417_v61 = vld [vmem:[%s2765_s1 + $0x8a0] sm:$0xff]  ;;  %v183_v21 = vld [vmem:[%s2765_s1 + $0x150] sm:$0xff] }
  0x4b   :  { %607 = vmatpush2.msra.mxu1 %v341_v22  ;;  %519 = vmatprep.subr.mxu0 %v210_v23  ;;  %v413_v7 = vld [vmem:[%s2765_s1 + $0x880] sm:$0xff] }
  0x4c   :  { %608 = vmatprep.subr.mxu1 %v338_v24  ;;  %520 = vmatpush2.msra.mxu0 %v209_v25  ;;  %v409_v15 = vld [vmem:[%s2765_s1 + $0x860] sm:$0xff]  ;;  %v402_v24 = vld [vmem:[%s2765_s1 + $0x828] sm:$0xff]  ;;  %v180_v25 = vld [vmem:[%s2765_s1 + $0x138] sm:$0xff] }
  0x4d   :  { %609 = vmatpush2.msra.mxu1 %v337_v26  ;;  %521 = vmatprep.subr.mxu0 %v206_v27  ;;  %v405_v23 = vld [vmem:[%s2765_s1 + $0x840] sm:$0xff]  ;;  %v179_v27 = vld [vmem:[%s2765_s1 + $0x130] sm:$0xff] }
  0x4e   :  { %610 = vmatprep.subr.mxu1 %v334_v28  ;;  %522 = vmatpush2.msra.mxu0 %v205_v29  ;;  %v401_v28 = vld [vmem:[%s2765_s1 + $0x820] sm:$0xff]  ;;  %v176_v29 = vld [vmem:[%s2765_s1 + $0x118] sm:$0xff] }
  0x4f   :  { %611 = vmatpush2.msra.mxu1 %v333_v30  ;;  %653 = vmatprep.subr.mxu0 %v426_v31  ;;  %v175_v31 = vld [vmem:[%s2765_s1 + $0x110] sm:$0xff] }
  0x50   :  { %726 = vmatprep.subr.mxu1 %v204_v32 }
  0x76   :  { %v1394_v34 = vpop.permute.xlu0 %1393 }
  0x77   :  { %v1404_v33 = vpop.permute.xlu1 %1403  ;;  %v1395_v40 = vunpack.i.l.bf16 %v1394_v34  ;;  %v1396_v45 = vunpack.i.h.bf16 %v1394_v34 }
  0x78   :  { %v1406_v35 = vunpack.i.h.bf16 %v1404_v33  ;;  %v1405_v37 = vunpack.i.l.bf16 %v1404_v33  ;;  %v397_v33 = vld [vmem:[%s2765_s1 + $0x800] sm:$0xff] }
  0x7a   :  { %v1955_v36 = vsel %vm124_vm0, %v1466_v1, %v1406_v35  ;;  %v1399_v39 = vpop.permute.xlu0 %1398  ;;  %v1964_v1 = vsel %vm124_vm0, %v1461_v0, %v1405_v37  ;;  %v422_v0 = vld [vmem:[%s2765_s1 + $0x8c8] sm:$0xff]  ;;  %v172_v35 = vld [vmem:[%s2765_s1 + $0xf8] sm:$0xff] }
  0x7b   :  { %v77_v38 = vpop.permute.xlu1 %76  ;;  %612 = vmatprep.mubr.f32.mxu1 %v1955_v36  ;;  %v1401_v43 = vunpack.i.h.bf16 %v1399_v39  ;;  %v1400_v44 = vunpack.i.l.bf16 %v1399_v39  ;;  %v332_v37 = vld [vmem:[%s2765_s1 + $0x5f8] sm:$0xff] }
  0x7d   :  { %v1959_v46 = vsel %vm124_vm0, %v1395_v40, %v1400_v44  ;;  %v1974_v51 = vsel %vm124_vm0, %v1396_v45, %v1401_v43  ;;  %v1427_v40 = vmov 0.0   ;;  %v331_v43 = vld [vmem:[%s2765_s1 + $0x5f0] sm:$0xff]  ;;  %v168_v44 = vld [vmem:[%s2765_s1 + $0xd8] sm:$0xff] }
  0x7e   :  { %v89_v48 = vpop.permute.xlu0 %88  ;;  %523 = vmatprep.mubr.f32.mxu0 %v1959_v46 }
  0x7f   :  { %v39_v47 = vpop.permute.xlu1 %38  ;;  %524 = vmatmul.mubr.f32.vlgmr.msra.gmra.mxu0 %v1964_v1  ;;  %v1977_v52 = vsel %vm124_vm0, %v77_v38, %v89_v48  ;;  %v171_v38 = vld [vmem:[%s2765_s1 + $0xf0] sm:$0xff] }
  0x80   :  { %529 = vmatprep.mubr.f32.mxu0 %v1974_v51  ;;  %613 = vmatmul.mubr.f32.vlgmr.msra.gmra.mxu1 %v1977_v52  ;;  %v1995_v56 = vsel %vm124_vm0, %v1471_v2, %v39_v47  ;;  %v195_v2 = vld [vmem:[%s2765_s1 + $0x1b0] sm:$0xff]  ;;  %v328_v47 = vld [vmem:[%s2765_s1 + $0x5d8] sm:$0xff] }
  0x81   :  { %654 = vmatpush1.msra.mxu0 %v425_v49  ;;  %727 = vmatpush1.msra.mxu1 %v203_v50  ;;  %v167_v49 = vld [vmem:[%s2765_s1 + $0xd0] sm:$0xff] }
  0x82   :  { %655 = vmatprep.subr.mxu0 %v422_v0  ;;  %728 = vmatprep.subr.mxu1 %v200_v53  ;;  %v1409_v59 = vpop.permute.xlu0 %1408  ;;  %v327_v50 = vld [vmem:[%s2765_s1 + $0x5d0] sm:$0xff] }
  0x83   :  { %v69_v58 = vpop.permute.xlu1 %68  ;;  %729 = vmatpush1.msra.mxu1 %v199_v54  ;;  %v1410_v62 = vunpack.i.l.bf16 %v1409_v59  ;;  %656 = vmatpush1.msra.mxu0 %v421_v55  ;;  %v1411_v8 = vunpack.i.h.bf16 %v1409_v59  ;;  %v164_v54 = vld [vmem:[%s2765_s1 + $0xb8] sm:$0xff]  ;;  %v163_v59 = vld [vmem:[%s2765_s1 + $0xb0] sm:$0xff] }
  0x84   :  { %530 = vmatmul.mubr.f32.gmra.mxu0 %v1995_v56  ;;  %657 = vmatprep.subr.mxu0 %v418_v57  ;;  %v324_v55 = vld [vmem:[%s2765_s1 + $0x5b8] sm:$0xff] }
  0x85   :  { %730 = vmatprep.subr.mxu1 %v196_v60  ;;  %658 = vmatpush1.msra.mxu0 %v417_v61  ;;  %v2020_v6 = vsel %vm124_vm0, %v1410_v62, %v69_v58  ;;  %v320_v60 = vld [vmem:[%s2765_s1 + $0x598] sm:$0xff] }
  0x86   :  { %731 = vmatpush1.msra.mxu1 %v195_v2  ;;  %659 = vmatprep.subr.mxu0 %v414_v3  ;;  %v41_v10 = vpop.permute.xlu0 %40  ;;  %v160_v61 = vld [vmem:[%s2765_s1 + $0x98] sm:$0xff]  ;;  %v319_v2 = vld [vmem:[%s2765_s1 + $0x590] sm:$0xff] }
  0x87   :  { %v71_v9 = vpop.permute.xlu1 %70  ;;  %732 = vmatprep.subr.mxu1 %v192_v4  ;;  %535 = vmatprep.mubr.f32.mxu0 %v2020_v6  ;;  %v2034_v13 = vsel %vm124_vm0, %v1523_v18, %v41_v10  ;;  %v406_v18 = vld [vmem:[%s2765_s1 + $0x848] sm:$0xff]  ;;  %v159_v4 = vld [vmem:[%s2765_s1 + $0x90] sm:$0xff] }
  0x88   :  { %733 = vmatpush1.msra.mxu1 %v191_v5  ;;  %660 = vmatpush1.msra.mxu0 %v413_v7  ;;  %v2043_v16 = vsel %vm124_vm0, %v1411_v8, %v71_v9  ;;  %v156_v7 = vld [vmem:[%s2765_s1 + $0x78] sm:$0xff]  ;;  %v155_v10 = vld [vmem:[%s2765_s1 + $0x70] sm:$0xff] }
  0x89   :  { %661 = vmatprep.subr.mxu0 %v410_v11  ;;  %734 = vmatprep.subr.mxu1 %v188_v12  ;;  %v316_v8 = vld [vmem:[%s2765_s1 + $0x578] sm:$0xff] }
  0x8a   :  { %536 = vmatmul.mubr.f32.gmra.mxu0 %v2034_v13  ;;  %735 = vmatpush1.msra.mxu1 %v187_v14  ;;  %v43_v22 = vpop.permute.xlu0 %42  ;;  %v312_v11 = vld [vmem:[%s2765_s1 + $0x558] sm:$0xff]  ;;  %v151_v14 = vld [vmem:[%s2765_s1 + $0x50] sm:$0xff] }
  0x8b   :  { %v2052_v20 = vpop.permute.xlu1 %116  ;;  %662 = vmatpush1.msra.mxu0 %v409_v15  ;;  %541 = vmatprep.mubr.f32.mxu0 %v2043_v16  ;;  %v2069_v26 = vsel %vm124_vm0, %v1528_v19, %v43_v22  ;;  %v398_v19 = vld [vmem:[%s2765_s1 + $0x808] sm:$0xff]  ;;  %v152_v12 = vld [vmem:[%s2765_s1 + $0x58] sm:$0xff] }
  0x8c   :  { %663 = vmatprep.subr.mxu0 %v406_v18  ;;  %736 = vmatprep.subr.mxu1 %v184_v17  ;;  %v311_v18 = vld [vmem:[%s2765_s1 + $0x550] sm:$0xff]  ;;  %v148_v22 = vld [vmem:[%s2765_s1 + $0x38] sm:$0xff] }
  0x8d   :  { %737 = vmatpush1.msra.mxu1 %v183_v21  ;;  %664 = vmatpush1.msra.mxu0 %v405_v23  ;;  %v308_v23 = vld [vmem:[%s2765_s1 + $0x538] sm:$0xff] }
  0x8e   :  { %665 = vmatprep.subr.mxu0 %v402_v24  ;;  %738 = vmatprep.subr.mxu1 %v180_v25  ;;  %v1414_v32 = vpop.permute.xlu0 %1413  ;;  %v147_v25 = vld [vmem:[%s2765_s1 + $0x30] sm:$0xff] }
  0x8f   :  { %v1419_v30 = vpop.permute.xlu1 %1418  ;;  %542 = vmatmul.mubr.f32.gmra.mxu0 %v2069_v26  ;;  %739 = vmatpush1.msra.mxu1 %v179_v27  ;;  %v1415_v34 = vunpack.i.l.bf16 %v1414_v32  ;;  %v1416_v53 = vunpack.i.h.bf16 %v1414_v32  ;;  %v144_v27 = vld [vmem:[%s2765_s1 + $0x18] sm:$0xff] }
  0x90   :  { %666 = vmatpush1.msra.mxu0 %v401_v28  ;;  %740 = vmatprep.subr.mxu1 %v176_v29  ;;  %v1420_v39 = vunpack.i.l.bf16 %v1419_v30  ;;  %v1421_v58 = vunpack.i.h.bf16 %v1419_v30  ;;  %v304_v28 = vld [vmem:[%s2765_s1 + $0x518] sm:$0xff]  ;;  %v143_v29 = vld [vmem:[%s2765_s1 + $0x10] sm:$0xff] }
  0x91   :  { %667 = vmatprep.subr.mxu0 %v398_v19  ;;  %741 = vmatpush1.msra.mxu1 %v175_v31  ;;  %v2119_v0 = vsel %vm124_vm0, %v1609_v41, %v1415_v34  ;;  %v323_v41 = vld [vmem:[%s2765_s1 + $0x5b0] sm:$0xff]  ;;  %v2152_v5 = vsel %vm124_vm0, %v1614_v42, %v1416_v53  ;;  %v268_v30 = vld [vmem:[%s2765_s1 + $0x3f8] sm:$0xff] }
  0x92   :  { %668 = vmatpush1.msra.mxu0 %v397_v33  ;;  %701 = vmatprep.mubr.f32.mxu0 %v1427_v40  ;;  %v91_v45 = vpop.permute.xlu0 %90  ;;  %v315_v42 = vld [vmem:[%s2765_s1 + $0x570] sm:$0xff]  ;;  %v300_v32 = vld [vmem:[%s2765_s1 + $0x4f8] sm:$0xff] }
  0x93   :  { %742 = vmatprep.subr.mxu1 %v172_v35  ;;  %815 = vmatprep.subr.mxu0 %v332_v37  ;;  %v93_v48 = vpop.permute.xlu1 %92  ;;  %v2128_v57 = vsel %vm124_vm0, %v1420_v39, %v91_v45  ;;  %v303_v19 = vld [vmem:[%s2765_s1 + $0x510] sm:$0xff]  ;;  %v264_v34 = vld [vmem:[%s2765_s1 + $0x3d8] sm:$0xff] }
  0x94   :  { %1307 = vmatmul.mubr.msk.f32.vlgmr.msra.gmra.mxu0 %vm124_vm0, %v2052_v20  ;;  %743 = vmatpush1.msra.mxu1 %v171_v38  ;;  %v2161_v9 = vsel %vm124_vm0, %v1421_v58, %v93_v48  ;;  %v299_v33 = vld [vmem:[%s2765_s1 + $0x4f0] sm:$0xff]  ;;  %v296_v35 = vld [vmem:[%s2765_s1 + $0x4d8] sm:$0xff] }
  0x95   :  { %816 = vmatpush1.msra.mxu0 %v331_v43  ;;  %744 = vmatprep.subr.mxu1 %v168_v44  ;;  %v263_v37 = vld [vmem:[%s2765_s1 + $0x3d0] sm:$0xff]  ;;  %v260_v39 = vld [vmem:[%s2765_s1 + $0x3b8] sm:$0xff] }
  0x96   :  { %817 = vmatprep.subr.mxu0 %v328_v47  ;;  %745 = vmatpush1.msra.mxu1 %v167_v49  ;;  %v111_v62 = vpop.permute.xlu0 %110  ;;  %v295_v38 = vld [vmem:[%s2765_s1 + $0x4d0] sm:$0xff]  ;;  %v292_v44 = vld [vmem:[%s2765_s1 + $0x4b8] sm:$0xff] }
  0x97   :  { %818 = vmatpush1.msra.mxu0 %v327_v50  ;;  %618 = vmatprep.mubr.f32.mxu1 %v2119_v0  ;;  %v83_v3 = vpop.permute.xlu1 %82  ;;  %v2187_v21 = vsel %vm124_vm0, %v1687_v63, %v111_v62  ;;  %v307_v63 = vld [vmem:[%s2765_s1 + $0x530] sm:$0xff]  ;;  %v256_v48 = vld [vmem:[%s2765_s1 + $0x398] sm:$0xff] }
  0x98   :  { %746 = vmatprep.subr.mxu1 %v164_v54  ;;  %819 = vmatprep.subr.mxu0 %v324_v55  ;;  %v259_v45 = vld [vmem:[%s2765_s1 + $0x3b0] sm:$0xff]  ;;  %v288_v49 = vld [vmem:[%s2765_s1 + $0x498] sm:$0xff] }
  0x99   :  { %619 = vmatmul.mubr.f32.gmra.mxu1 %v2128_v57  ;;  %820 = vmatpush1.msra.mxu0 %v323_v41  ;;  %v291_v47 = vld [vmem:[%s2765_s1 + $0x4b0] sm:$0xff]  ;;  %v252_v54 = vld [vmem:[%s2765_s1 + $0x378] sm:$0xff] }
  0x9a   :  { %747 = vmatpush1.msra.mxu1 %v163_v59  ;;  %821 = vmatprep.subr.mxu0 %v320_v60  ;;  %v95_v15 = vpop.permute.xlu0 %94  ;;  %v255_v50 = vld [vmem:[%s2765_s1 + $0x390] sm:$0xff]  ;;  %v284_v55 = vld [vmem:[%s2765_s1 + $0x478] sm:$0xff] }
  0x9b   :  { %748 = vmatprep.subr.mxu1 %v160_v61  ;;  %822 = vmatpush1.msra.mxu0 %v319_v2  ;;  %v2183_v17 = vpop.permute.xlu1 %118  ;;  %v2197_v24 = vsel %vm124_vm0, %v83_v3, %v95_v15  ;;  %v287_v53 = vld [vmem:[%s2765_s1 + $0x490] sm:$0xff]  ;;  %v248_v59 = vld [vmem:[%s2765_s1 + $0x358] sm:$0xff] }
  0x9c   :  { %749 = vmatpush1.msra.mxu1 %v159_v4  ;;  %624 = vmatprep.mubr.f32.mxu1 %v2152_v5  ;;  %v251_v41 = vld [vmem:[%s2765_s1 + $0x370] sm:$0xff]  ;;  %v244_v62 = vld [vmem:[%s2765_s1 + $0x338] sm:$0xff] }
  0x9d   :  { %750 = vmatprep.subr.mxu1 %v156_v7  ;;  %823 = vmatprep.subr.mxu0 %v316_v8  ;;  %v283_v58 = vld [vmem:[%s2765_s1 + $0x470] sm:$0xff]  ;;  %v276_v2 = vld [vmem:[%s2765_s1 + $0x438] sm:$0xff] }
  0x9e   :  { %625 = vmatmul.mubr.f32.gmra.mxu1 %v2161_v9  ;;  %824 = vmatpush1.msra.mxu0 %v315_v42  ;;  %v2225_v31 = vpop.permute.xlu0 %120  ;;  %v247_v60 = vld [vmem:[%s2765_s1 + $0x350] sm:$0xff]  ;;  %v240_v7 = vld [vmem:[%s2765_s1 + $0x318] sm:$0xff] }
  0x9f   :  { %751 = vmatpush1.msra.mxu1 %v155_v10  ;;  %825 = vmatprep.subr.mxu0 %v312_v11  ;;  %v2254_v43 = vpop.permute.xlu1 %122  ;;  %v279_v61 = vld [vmem:[%s2765_s1 + $0x450] sm:$0xff]  ;;  %v272_v8 = vld [vmem:[%s2765_s1 + $0x418] sm:$0xff] }
  0xa0   :  { %752 = vmatprep.subr.mxu1 %v152_v12  ;;  %707 = vmatprep.mubr.f32.mxu0 %v1427_v40  ;;  %v243_v3 = vld [vmem:[%s2765_s1 + $0x330] sm:$0xff]  ;;  %v236_v11 = vld [vmem:[%s2765_s1 + $0x2f8] sm:$0xff] }
  0xa1   :  { %753 = vmatpush1.msra.mxu1 %v151_v14  ;;  %826 = vmatpush1.msra.mxu0 %v311_v18  ;;  %v275_v4 = vld [vmem:[%s2765_s1 + $0x430] sm:$0xff]  ;;  %v396_v12 = vld [vmem:[%s2765_s1 + $0x7f8] sm:$0xff] }
  0xa2   :  { %630 = vmatprep.mubr.f32.mxu1 %v2187_v21  ;;  %1308 = vmatmul.mubr.msk.f32.gmra.mxu0 %vm124_vm0, %v2183_v17  ;;  %v239_v42 = vld [vmem:[%s2765_s1 + $0x310] sm:$0xff]  ;;  %v232_v18 = vld [vmem:[%s2765_s1 + $0x2d8] sm:$0xff] }
  0xa3   :  { %754 = vmatprep.subr.mxu1 %v148_v22  ;;  %827 = vmatprep.subr.mxu0 %v308_v23  ;;  %v271_v10 = vld [vmem:[%s2765_s1 + $0x410] sm:$0xff]  ;;  %v392_v22 = vld [vmem:[%s2765_s1 + $0x7d8] sm:$0xff] }
  0xa4   :  { %631 = vmatmul.mubr.f32.gmra.mxu1 %v2197_v24  ;;  %828 = vmatpush1.msra.mxu0 %v307_v63  ;;  %v235_v14 = vld [vmem:[%s2765_s1 + $0x2f0] sm:$0xff] }
  0xa5   :  { %755 = vmatpush1.msra.mxu1 %v147_v25  ;;  %790 = vmatprep.mubr.f32.mxu1 %v1959_v46  ;;  %v267_v46 = vld [vmem:[%s2765_s1 + $0x3f0] sm:$0xff]  ;;  %v228_v25 = vld [vmem:[%s2765_s1 + $0x2b8] sm:$0xff] }
  0xa6   :  { %756 = vmatprep.subr.mxu1 %v144_v27  ;;  %829 = vmatprep.subr.mxu0 %v304_v28  ;;  %v395_v15 = vld [vmem:[%s2765_s1 + $0x7f0] sm:$0xff]  ;;  %v388_v27 = vld [vmem:[%s2765_s1 + $0x7b8] sm:$0xff] }
  0xa7   :  { %757 = vmatpush1.msra.mxu1 %v143_v29  ;;  %713 = vmatprep.mubr.f32.mxu0 %v1427_v40  ;;  %v231_v23 = vld [vmem:[%s2765_s1 + $0x2d0] sm:$0xff] }
  0xa8   :  { %830 = vmatpush1.msra.mxu0 %v303_v19  ;;  %758 = vmatprep.subr.mxu1 %v268_v30  ;;  %v391_v63 = vld [vmem:[%s2765_s1 + $0x7d0] sm:$0xff]  ;;  %v224_v19 = vld [vmem:[%s2765_s1 + $0x298] sm:$0xff] }
  0xa9   :  { %1309 = vmatmul.mubr.msk.f32.gmra.mxu0 %vm124_vm0, %v2225_v31  ;;  %831 = vmatprep.subr.mxu0 %v300_v32  ;;  %v227_v28 = vld [vmem:[%s2765_s1 + $0x2b0] sm:$0xff]  ;;  %v384_v30 = vld [vmem:[%s2765_s1 + $0x798] sm:$0xff] }
  0xaa   :  { %759 = vmatpush2.msra.mxu1 %v267_v46  ;;  %832 = vmatpush1.msra.mxu0 %v299_v33  ;;  %v387_v29 = vld [vmem:[%s2765_s1 + $0x7b0] sm:$0xff]  ;;  %v220_v33 = vld [vmem:[%s2765_s1 + $0x278] sm:$0xff] }
  0xab   :  { %760 = vmatprep.subr.mxu1 %v264_v34  ;;  %833 = vmatprep.subr.mxu0 %v296_v35  ;;  %v223_v32 = vld [vmem:[%s2765_s1 + $0x290] sm:$0xff]  ;;  %v380_v34 = vld [vmem:[%s2765_s1 + $0x778] sm:$0xff] }
  0xac   :  { %719 = vmatprep.mubr.f32.mxu0 %v1427_v40  ;;  %761 = vmatpush2.msra.mxu1 %v263_v37  ;;  %v383_v46 = vld [vmem:[%s2765_s1 + $0x790] sm:$0xff] }
  0xad   :  { %834 = vmatpush1.msra.mxu0 %v295_v38  ;;  %762 = vmatprep.subr.mxu1 %v260_v39  ;;  %v219_v35 = vld [vmem:[%s2765_s1 + $0x270] sm:$0xff]  ;;  %v216_v38 = vld [vmem:[%s2765_s1 + $0x258] sm:$0xff] }
  0xae   :  { %1310 = vmatmul.mubr.msk.f32.gmra.mxu0 %vm124_vm0, %v2254_v43  ;;  %835 = vmatprep.subr.mxu0 %v292_v44  ;;  %v379_v37 = vld [vmem:[%s2765_s1 + $0x770] sm:$0xff]  ;;  %v376_v39 = vld [vmem:[%s2765_s1 + $0x758] sm:$0xff] }
  0xaf   :  { %763 = vmatpush2.msra.mxu1 %v259_v45  ;;  %836 = vmatpush1.msra.mxu0 %v291_v47  ;;  %v215_v44 = vld [vmem:[%s2765_s1 + $0x250] sm:$0xff]  ;;  %v212_v47 = vld [vmem:[%s2765_s1 + $0x238] sm:$0xff] }
  0xb0   :  { %879 = vmatprep.mubr.f32.mxu0 %v1955_v36  ;;  %764 = vmatprep.subr.mxu1 %v256_v48  ;;  %v280_v36 = vld [vmem:[%s2765_s1 + $0x458] sm:$0xff]  ;;  %v375_v45 = vld [vmem:[%s2765_s1 + $0x750] sm:$0xff] }
  0xb1   :  { %837 = vmatprep.subr.mxu0 %v288_v49  ;;  %765 = vmatpush2.msra.mxu1 %v255_v50  ;;  %v372_v48 = vld [vmem:[%s2765_s1 + $0x738] sm:$0xff]  ;;  %v211_v49 = vld [vmem:[%s2765_s1 + $0x230] sm:$0xff] }
  0xb2   :  { %838 = vmatpush1.msra.mxu0 %v287_v53  ;;  %766 = vmatprep.subr.mxu1 %v252_v54  ;;  %v371_v50 = vld [vmem:[%s2765_s1 + $0x730] sm:$0xff]  ;;  %v208_v53 = vld [vmem:[%s2765_s1 + $0x218] sm:$0xff] }
  0xb3   :  { %839 = vmatprep.subr.mxu0 %v284_v55  ;;  %767 = vmatpush2.msra.mxu1 %v251_v41  ;;  %v368_v54 = vld [vmem:[%s2765_s1 + $0x718] sm:$0xff]  ;;  %v207_v55 = vld [vmem:[%s2765_s1 + $0x210] sm:$0xff] }
  0xb4   :  { %840 = vmatpush1.msra.mxu0 %v283_v58  ;;  %768 = vmatprep.subr.mxu1 %v248_v59  ;;  %v367_v41 = vld [vmem:[%s2765_s1 + $0x710] sm:$0xff]  ;;  %v364_v58 = vld [vmem:[%s2765_s1 + $0x6f8] sm:$0xff] }
  0xb5   :  { %841 = vmatprep.subr.mxu0 %v280_v36  ;;  %769 = vmatpush2.msra.mxu1 %v247_v60  ;;  %v428_v59 = vld [vmem:[%s2765_s1 + $0x8f8] sm:$0xff]  ;;  %v363_v36 = vld [vmem:[%s2765_s1 + $0x6f0] sm:$0xff] }
  0xb6   :  { %842 = vmatpush1.msra.mxu0 %v279_v61  ;;  %770 = vmatprep.subr.mxu1 %v244_v62  ;;  %v427_v60 = vld [vmem:[%s2765_s1 + $0x8f0] sm:$0xff]  ;;  %v360_v61 = vld [vmem:[%s2765_s1 + $0x6d8] sm:$0xff] }
  0xb7   :  { %843 = vmatprep.subr.mxu0 %v276_v2  ;;  %771 = vmatpush2.msra.mxu1 %v243_v3  ;;  %v424_v62 = vld [vmem:[%s2765_s1 + $0x8d8] sm:$0xff]  ;;  %v359_v2 = vld [vmem:[%s2765_s1 + $0x6d0] sm:$0xff] }
  0xb8   :  { %844 = vmatpush1.msra.mxu0 %v275_v4  ;;  %772 = vmatprep.subr.mxu1 %v240_v7  ;;  %v356_v3 = vld [vmem:[%s2765_s1 + $0x6b8] sm:$0xff]  ;;  %v419_v7 = vld [vmem:[%s2765_s1 + $0x8b0] sm:$0xff] }
  0xb9   :  { %845 = vmatprep.subr.mxu0 %v272_v8  ;;  %773 = vmatpush2.msra.mxu1 %v239_v42  ;;  %v420_v4 = vld [vmem:[%s2765_s1 + $0x8b8] sm:$0xff] }
  0xba   :  { %846 = vmatpush1.msra.mxu0 %v271_v10  ;;  %774 = vmatprep.subr.mxu1 %v236_v11  ;;  %v352_v8 = vld [vmem:[%s2765_s1 + $0x698] sm:$0xff]  ;;  %v351_v10 = vld [vmem:[%s2765_s1 + $0x690] sm:$0xff] }
  0xbb   :  { %847 = vmatprep.subr.mxu0 %v396_v12  ;;  %775 = vmatpush2.msra.mxu1 %v235_v14  ;;  %v416_v42 = vld [vmem:[%s2765_s1 + $0x898] sm:$0xff]  ;;  %v415_v11 = vld [vmem:[%s2765_s1 + $0x890] sm:$0xff] }
  0xbc   :  { %848 = vmatpush2.msra.mxu0 %v395_v15  ;;  %776 = vmatprep.subr.mxu1 %v232_v18  ;;  %v412_v12 = vld [vmem:[%s2765_s1 + $0x878] sm:$0xff]  ;;  %v411_v14 = vld [vmem:[%s2765_s1 + $0x870] sm:$0xff] }
  0xbd   :  { %849 = vmatprep.subr.mxu0 %v392_v22  ;;  %777 = vmatpush2.msra.mxu1 %v231_v23  ;;  %v344_v15 = vld [vmem:[%s2765_s1 + $0x658] sm:$0xff]  ;;  %v343_v22 = vld [vmem:[%s2765_s1 + $0x650] sm:$0xff] }
  0xbe   :  { %850 = vmatpush2.msra.mxu0 %v391_v63  ;;  %778 = vmatprep.subr.mxu1 %v228_v25  ;;  %v408_v18 = vld [vmem:[%s2765_s1 + $0x858] sm:$0xff]  ;;  %v407_v23 = vld [vmem:[%s2765_s1 + $0x850] sm:$0xff] }
  0xbf   :  { %851 = vmatprep.subr.mxu0 %v388_v27  ;;  %779 = vmatpush2.msra.mxu1 %v227_v28  ;;  %v404_v63 = vld [vmem:[%s2765_s1 + $0x838] sm:$0xff]  ;;  %v403_v25 = vld [vmem:[%s2765_s1 + $0x830] sm:$0xff] }
  0xc0   :  { %852 = vmatpush2.msra.mxu0 %v387_v29  ;;  %780 = vmatprep.subr.mxu1 %v224_v19  ;;  %v336_v27 = vld [vmem:[%s2765_s1 + $0x618] sm:$0xff]  ;;  %v335_v29 = vld [vmem:[%s2765_s1 + $0x610] sm:$0xff] }
  0xc1   :  { %853 = vmatprep.subr.mxu0 %v384_v30  ;;  %781 = vmatpush2.msra.mxu1 %v223_v32  ;;  %v400_v28 = vld [vmem:[%s2765_s1 + $0x818] sm:$0xff]  ;;  %v399_v19 = vld [vmem:[%s2765_s1 + $0x810] sm:$0xff]  ;;  %v1083_v30 = vld [vmem:[%s2766_s3 + $0x48] sm:$0xff] }
  0xc2   :  { %854 = vmatpush2.msra.mxu0 %v383_v46  ;;  %782 = vmatprep.subr.mxu1 %v220_v33  ;;  %v1098_v32 = vld [vmem:[%s2766_s3 + $0xc0] sm:$0xff]  ;;  %v1097_v33 = vld [vmem:[%s2766_s3 + $0xb8] sm:$0xff] }
  0xc3   :  { %855 = vmatprep.subr.mxu0 %v380_v34  ;;  %783 = vmatpush2.msra.mxu1 %v219_v35  ;;  %v1082_v46 = vld [vmem:[%s2766_s3 + $0x40] sm:$0xff]  ;;  %v1081_v34 = vld [vmem:[%s2766_s3 + $0x38] sm:$0xff]  ;;  %v1096_v35 = vld [vmem:[%s2766_s3 + $0xb0] sm:$0xff] }
  0xc4   :  { %856 = vmatpush2.msra.mxu0 %v379_v37  ;;  %784 = vmatprep.subr.mxu1 %v216_v38  ;;  %v1080_v37 = vld [vmem:[%s2766_s3 + $0x30] sm:$0xff]  ;;  %v1095_v38 = vld [vmem:[%s2766_s3 + $0xa8] sm:$0xff] }
  0xc5   :  { %857 = vmatprep.subr.mxu0 %v376_v39  ;;  %785 = vmatpush2.msra.mxu1 %v215_v44  ;;  %v1079_v39 = vld [vmem:[%s2766_s3 + $0x28] sm:$0xff]  ;;  %v1094_v44 = vld [vmem:[%s2766_s3 + $0xa0] sm:$0xff] }
  0xc6   :  { %858 = vmatpush2.msra.mxu0 %v375_v45  ;;  %786 = vmatprep.subr.mxu1 %v212_v47  ;;  %v1078_v45 = vld [vmem:[%s2766_s3 + $0x20] sm:$0xff]  ;;  %v1093_v47 = vld [vmem:[%s2766_s3 + $0x98] sm:$0xff] }
  0xc7   :  { %859 = vmatprep.subr.mxu0 %v372_v48  ;;  %787 = vmatpush2.msra.mxu1 %v211_v49  ;;  %v1077_v48 = vld [vmem:[%s2766_s3 + $0x18] sm:$0xff]  ;;  %v1092_v49 = vld [vmem:[%s2766_s3 + $0x90] sm:$0xff] }
  0xc8   :  { %860 = vmatpush2.msra.mxu0 %v371_v50  ;;  %788 = vmatprep.subr.mxu1 %v208_v53  ;;  %v1076_v50 = vld [vmem:[%s2766_s3 + $0x10] sm:$0xff]  ;;  %v1091_v53 = vld [vmem:[%s2766_s3 + $0x88] sm:$0xff] }
  0xc9   :  { %861 = vmatprep.subr.mxu0 %v368_v54  ;;  %789 = vmatpush2.msra.mxu1 %v207_v55  ;;  %v1075_v54 = vld [vmem:[%s2766_s3 + $0x8] sm:$0xff]  ;;  %v1090_v55 = vld [vmem:[%s2766_s3 + $0x80] sm:$0xff] }
  0xca   :  { %862 = vmatpush2.msra.mxu0 %v367_v41  ;;  %791 = vmatmul.mubr.f32.vlgmr.msra.gmra.mxu1 %v1964_v1  ;;  %v423_v1 = vld [vmem:[%s2765_s1 + $0x8d0] sm:$0xff]  ;;  %v1074_v41 = vld [vmem:[%s2766_s3] sm:$0xff] }
  0xcb   :  { %863 = vmatprep.subr.mxu0 %v364_v58  ;;  %920 = vmatprep.subr.mxu1 %v428_v59  ;;  %v1137_v58 = vld [vmem:[%s2766_s3 + $0x1f8] sm:$0xff] }
  0xcc   :  { %796 = vmatprep.mubr.f32.mxu1 %v1974_v51  ;;  %864 = vmatpush2.msra.mxu0 %v363_v36  ;;  %v355_v51 = vld [vmem:[%s2765_s1 + $0x6b0] sm:$0xff]  ;;  %v1121_v59 = vld [vmem:[%s2766_s3 + $0x178] sm:$0xff] }
  0xcd   :  { %921 = vmatpush1.msra.mxu1 %v427_v60  ;;  %865 = vmatprep.subr.mxu0 %v360_v61  ;;  %v1136_v36 = vld [vmem:[%s2766_s3 + $0x1f0] sm:$0xff]  ;;  %v1135_v61 = vld [vmem:[%s2766_s3 + $0x1e8] sm:$0xff] }
  0xce   :  { %922 = vmatprep.subr.mxu1 %v424_v62  ;;  %866 = vmatpush2.msra.mxu0 %v359_v2  ;;  %v1120_v60 = vld [vmem:[%s2766_s3 + $0x170] sm:$0xff]  ;;  %v1119_v62 = vld [vmem:[%s2766_s3 + $0x168] sm:$0xff]  ;;  %v1134_v2 = vld [vmem:[%s2766_s3 + $0x1e0] sm:$0xff] }
  0xcf   :  { %923 = vmatpush1.msra.mxu1 %v423_v1  ;;  %867 = vmatprep.subr.mxu0 %v356_v3  ;;  %v1118_v1 = vld [vmem:[%s2766_s3 + $0x160] sm:$0xff]  ;;  %v1133_v3 = vld [vmem:[%s2766_s3 + $0x1d8] sm:$0xff] }
  0xd0   :  { %797 = vmatmul.mubr.f32.gmra.mxu1 %v1995_v56  ;;  %924 = vmatprep.subr.mxu1 %v420_v4  ;;  %v348_v56 = vld [vmem:[%s2765_s1 + $0x678] sm:$0xff] }
  0xd1   :  { %802 = vmatprep.mubr.f32.mxu1 %v2020_v6  ;;  %868 = vmatpush2.msra.mxu0 %v355_v51  ;;  %v347_v6 = vld [vmem:[%s2765_s1 + $0x670] sm:$0xff]  ;;  %v1117_v4 = vld [vmem:[%s2766_s3 + $0x158] sm:$0xff] }
  0xd2   :  { %925 = vmatpush1.msra.mxu1 %v419_v7  ;;  %869 = vmatprep.subr.mxu0 %v352_v8  ;;  %v1132_v51 = vld [vmem:[%s2766_s3 + $0x1d0] sm:$0xff]  ;;  %v1131_v8 = vld [vmem:[%s2766_s3 + $0x1c8] sm:$0xff] }
  0xd3   :  { %926 = vmatprep.subr.mxu1 %v416_v42  ;;  %870 = vmatpush2.msra.mxu0 %v351_v10  ;;  %v1116_v7 = vld [vmem:[%s2766_s3 + $0x150] sm:$0xff]  ;;  %v1115_v42 = vld [vmem:[%s2766_s3 + $0x148] sm:$0xff]  ;;  %v1130_v10 = vld [vmem:[%s2766_s3 + $0x1c0] sm:$0xff] }
  0xd4   :  { %927 = vmatpush1.msra.mxu1 %v415_v11  ;;  %871 = vmatprep.subr.mxu0 %v348_v56  ;;  %v1114_v11 = vld [vmem:[%s2766_s3 + $0x140] sm:$0xff]  ;;  %v1129_v56 = vld [vmem:[%s2766_s3 + $0x1b8] sm:$0xff] }
  0xd5   :  { %803 = vmatmul.mubr.f32.gmra.mxu1 %v2034_v13  ;;  %928 = vmatprep.subr.mxu1 %v412_v12  ;;  %v340_v13 = vld [vmem:[%s2765_s1 + $0x638] sm:$0xff] }
  0xd6   :  { %808 = vmatprep.mubr.f32.mxu1 %v2043_v16  ;;  %872 = vmatpush2.msra.mxu0 %v347_v6  ;;  %v339_v16 = vld [vmem:[%s2765_s1 + $0x630] sm:$0xff]  ;;  %v1113_v12 = vld [vmem:[%s2766_s3 + $0x138] sm:$0xff] }
  0xd7   :  { %929 = vmatpush1.msra.mxu1 %v411_v14  ;;  %873 = vmatprep.subr.mxu0 %v344_v15  ;;  %v1128_v6 = vld [vmem:[%s2766_s3 + $0x1b0] sm:$0xff]  ;;  %v1127_v15 = vld [vmem:[%s2766_s3 + $0x1a8] sm:$0xff] }
  0xd8   :  { %930 = vmatprep.subr.mxu1 %v408_v18  ;;  %874 = vmatpush2.msra.mxu0 %v343_v22  ;;  %v1112_v14 = vld [vmem:[%s2766_s3 + $0x130] sm:$0xff]  ;;  %v1111_v18 = vld [vmem:[%s2766_s3 + $0x128] sm:$0xff]  ;;  %v1126_v22 = vld [vmem:[%s2766_s3 + $0x1a0] sm:$0xff] }
  0xd9   :  { %931 = vmatpush1.msra.mxu1 %v407_v23  ;;  %875 = vmatprep.subr.mxu0 %v340_v13  ;;  %v1110_v23 = vld [vmem:[%s2766_s3 + $0x120] sm:$0xff]  ;;  %v1125_v13 = vld [vmem:[%s2766_s3 + $0x198] sm:$0xff] }
  0xda   :  { %809 = vmatmul.mubr.f32.gmra.mxu1 %v2069_v26  ;;  %932 = vmatprep.subr.mxu1 %v404_v63  ;;  %v1104_v26 = vld [vmem:[%s2766_s3 + $0xf0] sm:$0xff]  ;;  %v1109_v63 = vld [vmem:[%s2766_s3 + $0x118] sm:$0xff] }
  0xdb   :  { %876 = vmatpush2.msra.mxu0 %v339_v16  ;;  %933 = vmatpush1.msra.mxu1 %v403_v25  ;;  %v1124_v25 = vld [vmem:[%s2766_s3 + $0x190] sm:$0xff] }
  0xdc   :  { %877 = vmatprep.subr.mxu0 %v336_v27  ;;  %934 = vmatprep.subr.mxu1 %v400_v28  ;;  %v1108_v27 = vld [vmem:[%s2766_s3 + $0x110] sm:$0xff]  ;;  %v1123_v28 = vld [vmem:[%s2766_s3 + $0x188] sm:$0xff] }
  0xdd   :  { %878 = vmatpush2.msra.mxu0 %v335_v29  ;;  %935 = vmatpush1.msra.mxu1 %v399_v19  ;;  %v1107_v29 = vld [vmem:[%s2766_s3 + $0x108] sm:$0xff] }
  0xde   :  { %968 = vmatprep.mubr.f32.mxu1 %v1427_v40  ;;  %880 = vmatmul.mubr.f32.vlgmr.msra.gmra.mxu0 %v1977_v52  ;;  %v1105_v52 = vld [vmem:[%s2766_s3 + $0xf8] sm:$0xff] }
  0xdf   :  { %1311 = vmatmul.mubr.msk.f32.vlgmr.msra.gmra.mxu1 %vm124_vm0, %v2052_v20  ;;  %885 = vmatprep.mubr.f32.mxu0 %v2119_v0  ;;  %v1089_v20 = vld [vmem:[%s2766_s3 + $0x78] sm:$0xff]  ;;  %v1103_v0 = vld [vmem:[%s2766_s3 + $0xe8] sm:$0xff] }
  0xe0   :  { %974 = vmatprep.mubr.f32.mxu1 %v1427_v40  ;;  %1316 = vmatprep.subr.mxu0 %v1105_v52  ;;  %v1122_v52 = vld [vmem:[%s2766_s3 + $0x180] sm:$0xff] }
  0xe1   :  { %1317 = vmatpush3.msra.mxu0 %v1089_v20  ;;  %1351 = vmatprep.subr.mxu1 %v1137_v58  ;;  %v1106_v20 = vld [vmem:[%s2766_s3 + $0x100] sm:$0xff] }
  0xe2   :  { %886 = vmatmul.mubr.f32.gmra.mxu0 %v2128_v57  ;;  %1318 = vmatprep.subr.mxu0 %v1104_v26  ;;  %v1087_v57 = vld [vmem:[%s2766_s3 + $0x68] sm:$0xff] }
  0xe3   :  { %1312 = vmatmul.mubr.msk.f32.gmra.mxu1 %vm124_vm0, %v2183_v17  ;;  %891 = vmatprep.mubr.f32.mxu0 %v2152_v5  ;;  %v1102_v5 = vld [vmem:[%s2766_s3 + $0xe0] sm:$0xff]  ;;  %v1101_v17 = vld [vmem:[%s2766_s3 + $0xd8] sm:$0xff] }
  0xe4   :  { %980 = vmatprep.mubr.f32.mxu1 %v1427_v40  ;;  %1352 = vmatpush3.msra.mxu1 %v1121_v59 }
  0xe5   :  { %1353 = vmatprep.subr.mxu1 %v1136_v36 }
  0xe6   :  { %892 = vmatmul.mubr.f32.gmra.mxu0 %v2161_v9  ;;  %v1086_v9 = vld [vmem:[%s2766_s3 + $0x60] sm:$0xff]  ;;  %1354 = vmatpush3.msra.mxu1 %v1120_v60 }
  0xe7   :  { %1313 = vmatmul.mubr.msk.f32.gmra.mxu1 %vm124_vm0, %v2225_v31  ;;  %897 = vmatprep.mubr.f32.mxu0 %v2187_v21  ;;  %v1085_v21 = vld [vmem:[%s2766_s3 + $0x58] sm:$0xff]  ;;  %v1084_v31 = vld [vmem:[%s2766_s3 + $0x50] sm:$0xff] }
  0xe8   :  { %986 = vmatprep.mubr.f32.mxu1 %v1427_v40  ;;  %v1088_v40 = vld [vmem:[%s2766_s3 + $0x70] sm:$0xff]  ;;  %1355 = vmatprep.subr.mxu1 %v1135_v61 }
  0xe9   :  { %1319 = vmatpush3.msra.mxu0 %v1088_v40  ;;  %1356 = vmatpush3.msra.mxu1 %v1119_v62 }
  0xea   :  { %898 = vmatmul.mubr.f32.gmra.mxu0 %v2197_v24  ;;  %1320 = vmatprep.subr.mxu0 %v1103_v0  ;;  %v1100_v24 = vld [vmem:[%s2766_s3 + $0xd0] sm:$0xff]  ;;  %v431_v0 = vlaneseq }
  0xeb   :  { %1314 = vmatmul.mubr.msk.f32.gmra.mxu1 %vm124_vm0, %v2254_v43  ;;  %1321 = vmatpush3.msra.mxu0 %v1087_v57  ;;  %v1099_v43 = vld [vmem:[%s2766_s3 + $0xc8] sm:$0xff] }
  0xec   :  { %1322 = vmatprep.subr.mxu0 %v1102_v5  ;;  %1357 = vmatprep.subr.mxu1 %v1134_v2  ;;  %v2739_v5 = vshrl.u32 %v431_v0, 7 }
  0xed   :  { %1323 = vmatpush3.msra.mxu0 %v1086_v9  ;;  %1358 = vmatpush3.msra.mxu1 %v1118_v1 }
  0xee   :  { %1324 = vmatprep.subr.mxu0 %v1101_v17  ;;  %1359 = vmatprep.subr.mxu1 %v1133_v3 }
  0xef   :  { %1325 = vmatpush3.msra.mxu0 %v1085_v21  ;;  %1360 = vmatpush3.msra.mxu1 %v1117_v4  ;;  %v433_v21 = vsub.s32 0, %v2739_v5 }
  0xf0   :  { %1326 = vmatprep.subr.mxu0 %v1100_v24  ;;  %1361 = vmatprep.subr.mxu1 %v1132_v51 }
  0xf1   :  { %1327 = vmatpush3.msra.mxu0 %v1084_v31  ;;  %1362 = vmatpush3.msra.mxu1 %v1116_v7  ;;  %v2745_v31 = vld [vmem:[%s2767_s2] sm:$0xf] }
  0xf2   :  { %1328 = vmatprep.subr.mxu0 %v1099_v43  ;;  %1363 = vmatprep.subr.mxu1 %v1131_v8  ;;  %v437_v43 = vsub.s32 1, %v2739_v5 }
  0xf3   :  { %1329 = vmatpush3.msra.mxu0 %v1083_v30  ;;  %1364 = vmatpush3.msra.mxu1 %v1115_v42 }
  0xf4   :  { %1330 = vmatprep.subr.mxu0 %v1098_v32  ;;  %1365 = vmatprep.subr.mxu1 %v1130_v10  ;;  %v434_v32 = vrot.slane %v2745_v31, %v433_v21 }
  0xf5   :  { %1331 = vmatpush3.msra.mxu0 %v1082_v46  ;;  %1366 = vmatpush3.msra.mxu1 %v1114_v11 }
  0xf6   :  { %1332 = vmatprep.subr.mxu0 %v1097_v33  ;;  %1367 = vmatprep.subr.mxu1 %v1129_v56  ;;  %v438_v33 = vrot.slane %v2745_v31, %v437_v43 }
  0xf7   :  { %1333 = vmatpush3.msra.mxu0 %v1081_v34  ;;  %1368 = vmatpush3.msra.mxu1 %v1113_v12 }
  0xf8   :  { %1334 = vmatprep.subr.mxu0 %v1096_v35  ;;  %1369 = vmatprep.subr.mxu1 %v1128_v6 }
  0xf9   :  { %1335 = vmatpush3.msra.mxu0 %v1080_v37  ;;  %1370 = vmatpush3.msra.mxu1 %v1112_v14 }
  0xfa   :  { %1336 = vmatprep.subr.mxu0 %v1095_v38  ;;  %1371 = vmatprep.subr.mxu1 %v1127_v15 }
  0xfb   :  { %1337 = vmatpush3.msra.mxu0 %v1079_v39  ;;  %1372 = vmatpush3.msra.mxu1 %v1111_v18 }
  0xfc   :  { %1338 = vmatprep.subr.mxu0 %v1094_v44  ;;  %1373 = vmatprep.subr.mxu1 %v1126_v22 }
  0xfd   :  { %1339 = vmatpush3.msra.mxu0 %v1078_v45  ;;  %1374 = vmatpush3.msra.mxu1 %v1110_v23 }
  0xfe   :  { %1340 = vmatprep.subr.mxu0 %v1093_v47  ;;  %1375 = vmatprep.subr.mxu1 %v1125_v13 }
  0xff   :  { %1341 = vmatpush3.msra.mxu0 %v1077_v48  ;;  %1376 = vmatpush3.msra.mxu1 %v1109_v63 }
 0x100   :  { %1342 = vmatprep.subr.mxu0 %v1092_v49  ;;  %1377 = vmatprep.subr.mxu1 %v1124_v25 }
 0x101   :  { %1343 = vmatpush3.msra.mxu0 %v1076_v50  ;;  %1378 = vmatpush3.msra.mxu1 %v1108_v27 }
 0x102   :  { %1344 = vmatprep.subr.mxu0 %v1091_v53  ;;  %1379 = vmatprep.subr.mxu1 %v1123_v28 }
 0x103   :  { %1345 = vmatpush3.msra.mxu0 %v1075_v54  ;;  %1380 = vmatpush3.msra.mxu1 %v1107_v29 }
 0x104   :  { %1346 = vmatprep.subr.mxu0 %v1090_v55  ;;  %1381 = vmatprep.subr.mxu1 %v1122_v52 }
 0x105   :  { %1347 = vmatpush3.msra.mxu0 %v1074_v41  ;;  %1382 = vmatpush3.msra.mxu1 %v1106_v20 }
 0x13f   :  { %v525_v16 = vpop.f32.mrf.mxu0 }
 0x140   :  { %v614_v17 = vpop.f32.mrf.mxu1  ;;  %v526_v35 = vadd.f32 %v525_v16, %v434_v32 }
 0x141   :  { %v527_v19 = vpop.f32.mrf.mxu0 }
 0x142   :  { %v616_v30 = vpop.f32.mrf.mxu1  ;;  %v528_v39 = vadd.f32 %v527_v19, %v438_v33  ;;  %v615_v45 = vadd.f32 %v614_v17, %v526_v35 }
 0x144   :  { %v531_v26 = vpop.f32.mrf.mxu0  ;;  %v617_v49 = vadd.f32 %v616_v30, %v528_v39 }
 0x145   :  { %v532_v44 = vadd.f32 %v531_v26, %v434_v32 }
 0x146   :  { %v533_v40 = vpop.f32.mrf.mxu0 }
 0x147   :  { %v534_v50 = vadd.f32 %v533_v40, %v438_v33 }
 0x14a   :  { %v537_v57 = vpop.f32.mrf.mxu0 }
 0x14b   :  { %v538_v7 = vadd.f32 %v537_v57, %v434_v32 }
 0x14c   :  { %v539_v9 = vpop.f32.mrf.mxu0 }
 0x14d   :  { %v540_v10 = vadd.f32 %v539_v9, %v438_v33 }
 0x14f   :  { %v543_v24 = vpop.f32.mrf.mxu0 }
 0x150   :  { %v544_v11 = vadd.f32 %v543_v24, %v434_v32 }
 0x151   :  { %v545_v46 = vpop.f32.mrf.mxu0 }
 0x152   :  { %v546_v18 = vadd.f32 %v545_v46, %v438_v33 }
 0x154   :  { %v703_v37 = vpop.f32.mrf.mxu0 }
 0x155   :  { %v704_v54 = vadd.f32 %v703_v37, %v615_v45 }
 0x156   :  { %v705_v47 = vpop.f32.mrf.mxu0 }
 0x157   :  { %v706_v41 = vadd.f32 %v705_v47, %v617_v49  ;;  %v993_v2 = vmax.f32 %v704_v54, 0.0 }
 0x159   :  { %v620_v34 = vpop.f32.mrf.mxu1  ;;  %v994_v1 = vmax.f32 %v706_v41, 0.0 }
 0x15a   :  { %v621_v53 = vadd.f32 %v620_v34, %v532_v44 }
 0x15b   :  { %v622_v38 = vpop.f32.mrf.mxu1 }
 0x15c   :  { %v623_v58 = vadd.f32 %v622_v38, %v534_v50 }
 0x15e   :  { %v626_v48 = vpop.f32.mrf.mxu1 }
 0x15f   :  { %v627_v56 = vadd.f32 %v626_v48, %v538_v7 }
 0x160   :  { %v628_v36 = vpop.f32.mrf.mxu1 }
 0x161   :  { %v629_v22 = vadd.f32 %v628_v36, %v540_v10 }
 0x162   :  { %v709_v55 = vpop.f32.mrf.mxu0 }
 0x163   :  { %v710_v59 = vadd.f32 %v709_v55, %v621_v53 }
 0x164   :  { %v711_v60 = vpop.f32.mrf.mxu0  ;;  %v632_v51 = vpop.f32.mrf.mxu1 }
 0x165   :  { %v997_v61 = vmax.f32 %v710_v59, 0.0  ;;  %v712_v62 = vadd.f32 %v711_v60, %v623_v58  ;;  %v633_v23 = vadd.f32 %v632_v51, %v544_v11 }
 0x166   :  { %v634_v15 = vpop.f32.mrf.mxu1 }
 0x167   :  { %v998_v3 = vmax.f32 %v712_v62, 0.0  ;;  %v1009_v4 = vadd.f32 %v997_v61, %v993_v2  ;;  %v635_v25 = vadd.f32 %v634_v15, %v546_v18 }
 0x169   :  { %v1016_v8 = vadd.f32 %v998_v3, %v994_v1  ;;  %v715_v42 = vpop.f32.mrf.mxu0  ;;  %v1010_v14 = vrot.slane %v1009_v4, 4  ;;  %v441_v1 = vsub.s32 2, %v2739_v5 }
 0x16a   :  { %v716_v13 = vadd.f32 %v715_v42, %v627_v56 }
 0x16b   :  { %v1017_v12 = vrot.slane %v1016_v8, 4  ;;  %v717_v6 = vpop.f32.mrf.mxu0  ;;  %v1011_v29 = vadd.f32 %v1010_v14, %v1009_v4  ;;  %v445_v4 = vsub.s32 3, %v2739_v5  ;;  %v442_v7 = vrot.slane %v2745_v31, %v441_v1 }
 0x16c   :  { %v718_v27 = vadd.f32 %v717_v6, %v629_v22  ;;  %v1001_v52 = vmax.f32 %v716_v13, 0.0 }
 0x16d   :  { %v1018_v16 = vadd.f32 %v1017_v12, %v1016_v8  ;;  %v1012_v17 = vrot.slane %v1011_v29, 2  ;;  %v446_v42 = vrot.slane %v2745_v31, %v445_v4 }
 0x16e   :  { %v721_v63 = vpop.f32.mrf.mxu0  ;;  %v1002_v0 = vmax.f32 %v718_v27, 0.0 }
 0x16f   :  { %v722_v28 = vadd.f32 %v721_v63, %v633_v23  ;;  %v1019_v40 = vrot.slane %v1018_v16, 2  ;;  %v1013_v46 = vadd.f32 %v1012_v17, %v1011_v29 }
 0x170   :  { %v723_v19 = vpop.f32.mrf.mxu0 }
 0x171   :  { %v1005_v20 = vmax.f32 %v722_v28, 0.0  ;;  %v724_v26 = vadd.f32 %v723_v19, %v635_v25  ;;  %v1020_v43 = vadd.f32 %v1019_v40, %v1018_v16  ;;  %v1014_v39 = vrot.slane %v1013_v46, 1 }
 0x173   :  { %v1037_v57 = vadd.f32 %v1005_v20, %v1001_v52  ;;  %v1006_v9 = vmax.f32 %v724_v26, 0.0  ;;  %v1021_v38 = vrot.slane %v1020_v43, 1  ;;  %v1015_v50 = vadd.f32 %v1014_v39, %v1013_v46 }
 0x175   :  { %v1038_v21 = vrot.slane %v1037_v57, 4  ;;  %v1044_v24 = vadd.f32 %v1006_v9, %v1002_v0  ;;  %v1022_v48 = vadd.f32 %v1021_v38, %v1020_v43  ;;  %v1066_v58 = vmul.f32 0.0625, %v1015_v50 }
 0x177   :  { %v1039_v30 = vadd.f32 %v1038_v21, %v1037_v57  ;;  %v1045_v32 = vrot.slane %v1044_v24, 4  ;;  %v1067_v55 = vmul.f32 0.0625, %v1022_v48 }
 0x179   :  { %v1040_v33 = vrot.slane %v1039_v30, 2  ;;  %v1046_v34 = vadd.f32 %v1045_v32, %v1044_v24 }
 0x17b   :  { %v1041_v35 = vadd.f32 %v1040_v33, %v1039_v30  ;;  %v1047_v37 = vrot.slane %v1046_v34, 2 }
 0x17d   :  { %v1042_v44 = vrot.slane %v1041_v35, 1  ;;  %v1048_v45 = vadd.f32 %v1047_v37, %v1046_v34 }
 0x17f   :  { %v1043_v47 = vadd.f32 %v1042_v44, %v1041_v35  ;;  %v1049_v49 = vrot.slane %v1048_v45, 1 }
 0x181   :  { %v1050_v53 = vadd.f32 %v1049_v49, %v1048_v45  ;;  %v1070_v54 = vmul.f32 0.0625, %v1043_v47 }
 0x183   :  { %v1071_v41 = vmul.f32 0.0625, %v1050_v53  ;;  %v1154_v36 = vsel %vm1153_vm1, %v1070_v54, %v1066_v58 }
 0x185   :  { %v1155_v59 = vsel %vm1153_vm1, %v1071_v41, %v1067_v55 }
 0x186   :  { %1226 = vmatprep.mubr.f32.mxu0 %v1155_v59 }
 0x187   :  { %1227 = vmatmul.mubr.f32.vlgmr.msra.gmra.mxu0 %v1154_v36 }
 0x18a   :  { %v792_v60 = vpop.f32.mrf.mxu1 }
 0x18b   :  { %v793_v11 = vadd.f32 %v792_v60, %v442_v7 }
 0x18c   :  { %v794_v61 = vpop.f32.mrf.mxu1 }
 0x18d   :  { %v795_v12 = vadd.f32 %v794_v61, %v446_v42 }
 0x190   :  { %v798_v62 = vpop.f32.mrf.mxu1 }
 0x191   :  { %v799_v18 = vadd.f32 %v798_v62, %v442_v7 }
 0x192   :  { %v800_v2 = vpop.f32.mrf.mxu1 }
 0x193   :  { %v801_v63 = vadd.f32 %v800_v2, %v446_v42 }
 0x195   :  { %v804_v3 = vpop.f32.mrf.mxu1 }
 0x196   :  { %v805_v52 = vadd.f32 %v804_v3, %v442_v7 }
 0x197   :  { %v806_v51 = vpop.f32.mrf.mxu1 }
 0x198   :  { %v807_v26 = vadd.f32 %v806_v51, %v446_v42 }
 0x19a   :  { %v810_v8 = vpop.f32.mrf.mxu1 }
 0x19b   :  { %v811_v33 = vadd.f32 %v810_v8, %v442_v7 }
 0x19c   :  { %v812_v10 = vpop.f32.mrf.mxu1 }
 0x19d   :  { %v813_v35 = vadd.f32 %v812_v10, %v446_v42 }
 0x19e   :  { %v881_v56 = vpop.f32.mrf.mxu0 }
 0x19f   :  { %v882_v6 = vadd.f32 %v881_v56, %v793_v11  ;;  %v970_v14 = vpop.f32.mrf.mxu1 }
 0x1a0   :  { %v883_v15 = vpop.f32.mrf.mxu0 }
 0x1a1   :  { %v884_v22 = vadd.f32 %v883_v15, %v795_v12  ;;  %v972_v23 = vpop.f32.mrf.mxu1  ;;  %v971_v16 = vadd.f32 %v970_v14, %v882_v6 }
 0x1a2   :  { %v887_v13 = vpop.f32.mrf.mxu0 }
 0x1a3   :  { %v888_v5 = vadd.f32 %v887_v13, %v799_v18  ;;  %v976_v25 = vpop.f32.mrf.mxu1  ;;  %v973_v28 = vadd.f32 %v972_v23, %v884_v22  ;;  %v995_v40 = vmax.f32 %v971_v16, 0.0 }
 0x1a4   :  { %v889_v27 = vpop.f32.mrf.mxu0 }
 0x1a5   :  { %v977_v29 = vadd.f32 %v976_v25, %v888_v5  ;;  %v890_v19 = vadd.f32 %v889_v27, %v801_v63  ;;  %v978_v31 = vpop.f32.mrf.mxu1  ;;  %v996_v24 = vmax.f32 %v973_v28, 0.0 }
 0x1a6   :  { %v893_v20 = vpop.f32.mrf.mxu0 }
 0x1a7   :  { %v999_v0 = vmax.f32 %v977_v29, 0.0  ;;  %v979_v57 = vadd.f32 %v978_v31, %v890_v19  ;;  %v982_v9 = vpop.f32.mrf.mxu1  ;;  %v894_v17 = vadd.f32 %v893_v20, %v805_v52 }
 0x1a8   :  { %v895_v21 = vpop.f32.mrf.mxu0 }
 0x1a9   :  { %v1023_v43 = vadd.f32 %v999_v0, %v995_v40  ;;  %v1000_v30 = vmax.f32 %v979_v57, 0.0  ;;  %v896_v32 = vadd.f32 %v895_v21, %v807_v26  ;;  %v984_v46 = vpop.f32.mrf.mxu1  ;;  %v983_v44 = vadd.f32 %v982_v9, %v894_v17  ;;  %v1315_v26 = vld [vmem:[%s2768_s4] ss:$0 sm:$0xff] }
 0x1aa   :  { %v899_v34 = vpop.f32.mrf.mxu0 }
 0x1ab   :  { %v1024_v37 = vrot.slane %v1023_v43, 4  ;;  %v1030_v38 = vadd.f32 %v1000_v30, %v996_v24  ;;  %v988_v39 = vpop.f32.mrf.mxu1  ;;  %v900_v45 = vadd.f32 %v899_v34, %v811_v33  ;;  %v985_v49 = vadd.f32 %v984_v46, %v896_v32 }
 0x1ac   :  { %v901_v47 = vpop.f32.mrf.mxu0  ;;  %v1003_v59 = vmax.f32 %v983_v44, 0.0 }
 0x1ad   :  { %v1031_v48 = vrot.slane %v1030_v38, 4  ;;  %v902_v50 = vadd.f32 %v901_v47, %v813_v35  ;;  %v1025_v53 = vadd.f32 %v1024_v37, %v1023_v43  ;;  %v989_v54 = vadd.f32 %v988_v39, %v900_v45  ;;  %v990_v55 = vpop.f32.mrf.mxu1 }
 0x1ae   :  { %v1004_v61 = vmax.f32 %v985_v49, 0.0 }
 0x1af   :  { %v1032_v41 = vadd.f32 %v1031_v48, %v1030_v38  ;;  %v991_v58 = vadd.f32 %v990_v55, %v902_v50  ;;  %v1007_v36 = vmax.f32 %v989_v54, 0.0  ;;  %v1026_v2 = vrot.slane %v1025_v53, 2 }
 0x1b1   :  { %v1033_v60 = vrot.slane %v1032_v41, 2  ;;  %v1008_v62 = vmax.f32 %v991_v58, 0.0  ;;  %v1051_v1 = vadd.f32 %v1007_v36, %v1003_v59  ;;  %v1027_v8 = vadd.f32 %v1026_v2, %v1025_v53 }
 0x1b3   :  { %v1058_v3 = vadd.f32 %v1008_v62, %v1004_v61  ;;  %v1052_v4 = vrot.slane %v1051_v1, 4  ;;  %v1034_v51 = vadd.f32 %v1033_v60, %v1032_v41  ;;  %v1028_v6 = vrot.slane %v1027_v8, 1 }
 0x1b5   :  { %v1059_v7 = vrot.slane %v1058_v3, 4  ;;  %v1053_v42 = vadd.f32 %v1052_v4, %v1051_v1  ;;  %v1035_v12 = vrot.slane %v1034_v51, 1  ;;  %v1029_v13 = vadd.f32 %v1028_v6, %v1027_v8 }
 0x1b7   :  { %v1060_v10 = vadd.f32 %v1059_v7, %v1058_v3  ;;  %v1054_v11 = vrot.slane %v1053_v42, 2  ;;  %v1036_v22 = vadd.f32 %v1035_v12, %v1034_v51  ;;  %v1068_v28 = vmul.f32 0.0625, %v1029_v13 }
 0x1b9   :  { %v1061_v56 = vrot.slane %v1060_v10, 2  ;;  %v1055_v14 = vadd.f32 %v1054_v11, %v1053_v42  ;;  %v1069_v25 = vmul.f32 0.0625, %v1036_v22 }
 0x1bb   :  { %v1062_v15 = vadd.f32 %v1061_v56, %v1060_v10  ;;  %v1056_v18 = vrot.slane %v1055_v14, 1 }
 0x1bd   :  { %v1063_v23 = vrot.slane %v1062_v15, 1  ;;  %v1057_v63 = vadd.f32 %v1056_v18, %v1055_v14 }
 0x1bf   :  { %v1064_v16 = vadd.f32 %v1063_v23, %v1062_v15  ;;  %v1072_v5 = vmul.f32 0.0625, %v1057_v63 }
 0x1c1   :  { %v1073_v27 = vmul.f32 0.0625, %v1064_v16  ;;  %v1156_v19 = vsel %vm1153_vm1, %v1072_v5, %v1068_v28 }
 0x1c3   :  { %v1157_v29 = vsel %vm1153_vm1, %v1073_v27, %v1069_v25 }
 0x1c4   :  { %1296 = vmatprep.mubr.f32.mxu1 %v1157_v29 }
 0x1c5   :  { %1297 = vmatmul.mubr.f32.vlgmr.msra.gmra.mxu1 %v1156_v19 }
 0x247   :  { %v1348_v31 = vpop.f32.mrf.mxu0 }
 0x249   :  { %v1349_v52 = vpop.f32.mrf.mxu0 }
 0x24a   :  { %v1350_v20 = vadd.f32 %v1349_v52, %v1348_v31 }
 0x24c   :  { %v1229_v57 = vadd.f32 %v1350_v20, %v1315_v26 }
 0x285   :  { %v1383_v40 = vpop.f32.mrf.mxu1 }
 0x287   :  { %v1384_v0 = vpop.f32.mrf.mxu1 }
 0x288   :  { %v1385_v9 = vadd.f32 %v1384_v0, %v1383_v40 }
 0x28a   :  { %v1299_v17 = vadd.f32 %v1385_v9, %v1229_v57 }
 0x28c   :  { %1302 = vst [vmem:[%s2769_s5] sm:$0x3] %v1299_v17 }

</bundles_post_ra>
